<compile_context>
chip_gen: v7x
topology: tpu7x:2x2x1
jax: 0.10.0
libtpu: 0.0.40
codegen_flags: <defaults>
</compile_context>

<pallas_src>
import functools

import jax
import jax.numpy as jnp
from jax.experimental import pallas as pl
from jax.experimental.pallas import tpu as pltpu

_LANE = 128


def _node_model_kernel(row_ref, col_ref, ea_ref, x_ref, batch_ref, u_ref,
                       w1ax_ref, w1ae_ref, b1a_ref, w1b_ref, b1b_ref,
                       w2ax_ref, w2am_ref, w2au_ref, b2a_ref, w2b_ref, b2b_ref,
                       out_ref,
                       sums_ref, xw_ref, *, count_col):
    k = pl.program_id(0)
    n_steps = pl.num_programs(0)

    N = x_ref.shape[0]
    B = u_ref.shape[0]
    TE = row_ref.shape[0]

    @pl.when(k == 0)
    def _init():
        sums_ref[...] = jnp.zeros_like(sums_ref)
        # Grid-invariant: project node features through MLP1's x-slice once,
        # stored in bf16 so the hot-loop gather matmul is bf16 x bf16.
        xw_ref[...] = jnp.dot(
            x_ref[...], w1ax_ref[...],
            preferred_element_type=jnp.float32).astype(xw_ref.dtype)

    row = row_ref[...]                                                 # (TE, 1) int32
    col = col_ref[...]                                                 # (1, TE) int32

    # Sentinel-padded edges carry index N, which never matches -> zero rows /
    # columns in the one-hots, so no explicit validity masking is needed.
    node_lane = jax.lax.broadcasted_iota(jnp.int32, (TE, N), 1)
    node_sub = jax.lax.broadcasted_iota(jnp.int32, (N, TE), 0)
    onehot_row = (node_lane == row).astype(jnp.bfloat16)               # (TE, N)
    onehot_col = (node_sub == col).astype(jnp.bfloat16)                # (N, TE)

    # node_mlp_1 on this edge tile (concat avoided via split weights).
    h1 = jnp.dot(onehot_row, xw_ref[...],
                 preferred_element_type=jnp.float32)                   # x[row] @ W1_x
    h1 = h1 + jnp.dot(ea_ref[...], w1ae_ref[...],
                      preferred_element_type=jnp.float32)
    h1 = jnp.maximum(h1 + b1a_ref[...], 0.0)
    # b1b has 1.0 in the (zero-weight) padded lane `count_col`, so the scatter
    # matmul below accumulates per-node edge counts for free.
    m1 = jnp.dot(h1.astype(jnp.bfloat16), w1b_ref[...],
                 preferred_element_type=jnp.float32) + b1b_ref[...]    # (TE, F_m_pad)

    # Segment-sum into per-node accumulators (scatter as one-hot matmul).
    sums_ref[...] += jnp.dot(onehot_col, m1.astype(jnp.bfloat16),
                             preferred_element_type=jnp.float32)       # (N, F_m_pad)

    @pl.when(k == n_steps - 1)
    def _finalize():
        sums = sums_ref[...]
        counts = sums[:, count_col:count_col + 1]                      # (N, 1)
        # Exact divide (one-shot, not in the hot loop); zero-degree nodes stay 0
        # because their sums are already 0.
        means = sums / jnp.maximum(counts, 1.0)

        # u[batch] gather, folded into the W2_u projection (tiny B x H2 matmul).
        uw = jnp.dot(u_ref[...], w2au_ref[...],
                     preferred_element_type=jnp.float32)               # (B, H2)
        g_lane = jax.lax.broadcasted_iota(jnp.int32, (N, B), 1)
        onehot_g = (g_lane == batch_ref[...]).astype(jnp.float32)      # (N, B)

        # node_mlp_2 (concat avoided via split weights), one-shot in f32.
        h2 = jnp.dot(x_ref[...], w2ax_ref[...],
                     preferred_element_type=jnp.float32)
        h2 = h2 + jnp.dot(means, w2am_ref[...],
                          preferred_element_type=jnp.float32)
        h2 = h2 + jnp.dot(onehot_g, uw,
                          preferred_element_type=jnp.float32) + b2a_ref[...]
        h2 = jnp.maximum(h2, 0.0)
        y = jnp.dot(h2, w2b_ref[...],
                    preferred_element_type=jnp.float32) + b2b_ref[...]
        out_ref[...] = y.astype(out_ref.dtype)


def _pad_cols(a, target):
    return jnp.pad(a, ((0, 0), (0, target - a.shape[1])))


def _pad_rows(a, target):
    return jnp.pad(a, ((0, target - a.shape[0]), (0, 0)))


def node_model_pallas(x, edge_index, edge_attr, u, batch,
                      w1a, b1a, w1b, b1b, w2a, b2a, w2b, b2b,
                      *, tile_e=512, vmem_limit_bytes=48 * 1024 * 1024):
    """NodeModel forward.  x:[N,Fx], edge_index:[2,E] i32, edge_attr:[E,Fe],
    u:[B,Fu], batch:[N] i32.  Returns [N, F_out] f32."""
    N, F_x = x.shape
    E, F_e = edge_attr.shape
    B, F_u = u.shape
    H1 = w1a.shape[1]
    F_m = w1b.shape[1]
    H2 = w2a.shape[1]
    F_out = w2b.shape[1]

    assert tile_e % _LANE == 0, "edge tile must be a multiple of 128 lanes"
    num_tiles = pl.cdiv(E, tile_e)
    E_pad = num_tiles * tile_e

    # Lane-dense padding of MLP1 output width (+1 spare lane for the fused
    # edge count) and of the final output width.
    F_m_p = pl.cdiv(F_m + 1, _LANE) * _LANE
    F_out_p = pl.cdiv(F_out, _LANE) * _LANE

    # Split concat-form weights row-wise; zero-pad where needed (exact).
    w1a_x = w1a[:F_x].astype(jnp.float32)                 # used once at k==0
    w1a_e = w1a[F_x:].astype(jnp.bfloat16)                # hot loop (bf16 MXU)
    b1a_ = b1a.reshape(1, H1).astype(jnp.float32)
    w1b_p = _pad_cols(w1b.astype(jnp.float32), F_m_p).astype(jnp.bfloat16)
    b1b_p = jnp.zeros((1, F_m_p), jnp.float32)
    b1b_p = b1b_p.at[:, :F_m].set(b1b.reshape(1, F_m).astype(jnp.float32))
    b1b_p = b1b_p.at[:, F_m].set(1.0)                     # count lane

    w2a_x = w2a[:F_x].astype(jnp.float32)
    w2a_m = _pad_rows(w2a[F_x:F_x + F_m].astype(jnp.float32), F_m_p)  # row F_m is 0
    w2a_u = w2a[F_x + F_m:].astype(jnp.float32)
    b2a_ = b2a.reshape(1, H2).astype(jnp.float32)
    w2b_p = _pad_cols(w2b.astype(jnp.float32), F_out_p)
    b2b_p = _pad_cols(b2b.reshape(1, F_out).astype(jnp.float32), F_out_p)

    # Pad the edge axis to a multiple of tile_e: sentinel node index N (never
    # matches a real node -> zero one-hot rows/cols), zero edge features.
    row = edge_index[0].astype(jnp.int32)
    col = edge_index[1].astype(jnp.int32)
    ea = edge_attr.astype(jnp.bfloat16)
    if E_pad != E:
        pad = E_pad - E
        row = jnp.pad(row, (0, pad), constant_values=N)
        col = jnp.pad(col, (0, pad), constant_values=N)
        ea = jnp.pad(ea, ((0, pad), (0, 0)))
    row = row.reshape(E_pad, 1)                           # sublane-oriented
    col = col.reshape(1, E_pad)                           # lane-oriented
    batch2d = batch.reshape(N, 1).astype(jnp.int32)
    x = x.astype(jnp.float32)
    u = u.astype(jnp.float32)

    # NOTE: these blocks never change across the grid; if supported, a
    # pipeline_mode=pl.Buffered(1) on them would save a redundant second
    # pipeline buffer's worth of VMEM.
    resident = lambda shape: pl.BlockSpec(shape, lambda k: (0, 0))

    grid_spec = pltpu.PrefetchScalarGridSpec(
        num_scalar_prefetch=0,
        grid=(num_tiles,),
        in_specs=[
            pl.BlockSpec((tile_e, 1), lambda k: (k, 0)),      # row (streamed)
            pl.BlockSpec((1, tile_e), lambda k: (0, k)),      # col (streamed)
            pl.BlockSpec((tile_e, F_e), lambda k: (k, 0)),    # edge_attr (streamed, bf16)
            resident((N, F_x)),                               # x
            resident((N, 1)),                                 # batch
            resident((B, F_u)),                               # u
            resident((F_x, H1)),                              # W1_x (f32)
            resident((F_e, H1)),                              # W1_e (bf16)
            resident((1, H1)),                                # b1a
            resident((H1, F_m_p)),                            # W1b (padded, bf16)
            resident((1, F_m_p)),                             # b1b (padded, +count lane)
            resident((F_x, H2)),                              # W2_x
            resident((F_m_p, H2)),                            # W2_m (padded rows)
            resident((F_u, H2)),                              # W2_u
            resident((1, H2)),                                # b2a
            resident((H2, F_out_p)),                          # W2b (padded)
            resident((1, F_out_p)),                           # b2b (padded)
        ],
        out_specs=pl.BlockSpec((N, F_out_p), lambda k: (0, 0)),
        scratch_shapes=[
            pltpu.VMEM((N, F_m_p), jnp.float32),              # per-node sums (+counts lane)
            pltpu.VMEM((N, H1), jnp.bfloat16),                # hoisted x @ W1_x
        ],
    )

    y_full = pl.pallas_call(
        functools.partial(_node_model_kernel, count_col=F_m),
        out_shape=jax.ShapeDtypeStruct((N, F_out_p), jnp.float32),
        grid_spec=grid_spec,
        compiler_params=pltpu.CompilerParams(
            dimension_semantics=("arbitrary",),               # edge axis is a reduction
            vmem_limit_bytes=vmem_limit_bytes),
    )(row, col, ea, x, batch2d, u,
      w1a_x, w1a_e, b1a_, w1b_p, b1b_p,
      w2a_x, w2a_m, w2a_u, b2a_, w2b_p, b2b_p)

    return y_full[:, :F_out]


def node_model_ref(x, edge_index, edge_attr, u, batch,
                   w1a, b1a, w1b, b1b, w2a, b2a, w2b, b2b):
    """Plain-JAX f32 reference mirroring the PyTorch NodeModel.forward."""
    N = x.shape[0]
    E = edge_attr.shape[0]
    row, col = edge_index[0], edge_index[1]
    out = jnp.concatenate([x[row], edge_attr], axis=1)
    out = jnp.maximum(out @ w1a + b1a, 0.0) @ w1b + b1b
    sums = jax.ops.segment_sum(out, col, num_segments=N)
    counts = jax.ops.segment_sum(jnp.ones((E,), x.dtype), col,
                                 num_segments=N)[:, None]
    mean = jnp.where(counts > 0, sums / jnp.maximum(counts, 1.0), 0.0)
    feat = jnp.concatenate([x, mean, u[batch]], axis=1)
    return jnp.maximum(feat @ w2a + b2a, 0.0) @ w2b + b2b


if __name__ == "__main__":
    # Small deterministic shapes consistent with the module's forward.
    N, E, B = 32, 256, 2            # nodes, edges, graphs
    F_x, F_e, F_u = 8, 8, 8         # node / edge / global feature dims
    H1, F_m = 32, 16                # node_mlp_1 hidden / output dims
    H2, F_out = 32, 8               # node_mlp_2 hidden / output dims

    key = jax.random.PRNGKey(0)
    ks = jax.random.split(key, 13)

    x = jax.random.normal(ks[0], (N, F_x), dtype=jnp.float32)
    edge_attr = jax.random.normal(ks[1], (E, F_e), dtype=jnp.float32)
    u = jax.random.normal(ks[2], (B, F_u), dtype=jnp.float32)
    row = jax.random.randint(ks[3], (E,), 0, N, dtype=jnp.int32)
    col = jax.random.randint(ks[4], (E,), 0, N, dtype=jnp.int32)
    edge_index = jnp.stack([row, col])
    batch = (jnp.arange(N, dtype=jnp.int32) * B) // N   # contiguous graph ids

    # Deterministic synthetic "Linear" parameters (concat-form layout).
    w1a = jax.random.normal(ks[5], (F_x + F_e, H1), dtype=jnp.float32) * 0.1
    b1a = jax.random.normal(ks[6], (1, H1), dtype=jnp.float32) * 0.1
    w1b = jax.random.normal(ks[7], (H1, F_m), dtype=jnp.float32) * 0.1
    b1b = jax.random.normal(ks[8], (1, F_m), dtype=jnp.float32) * 0.1
    w2a = jax.random.normal(ks[9], (F_x + F_m + F_u, H2), dtype=jnp.float32) * 0.1
    b2a = jax.random.normal(ks[10], (1, H2), dtype=jnp.float32) * 0.1
    w2b = jax.random.normal(ks[11], (H2, F_out), dtype=jnp.float32) * 0.1
    b2b = jax.random.normal(ks[12], (1, F_out), dtype=jnp.float32) * 0.1

    y = node_model_pallas(x, edge_index, edge_attr, u, batch,
                          w1a, b1a, w1b, b1b, w2a, b2a, w2b, b2b, tile_e=512)
    jax.block_until_ready(y)

    y_ref = node_model_ref(x, edge_index, edge_attr, u, batch,
                           w1a, b1a, w1b, b1b, w2a, b2a, w2b, b2b)
    assert y.shape == (N, F_out)
    # Tolerance accounts for bf16 MXU operands in the hot loop (f32 accumulate,
    # f32 finalize); the mean division itself is exact.
    assert jnp.allclose(y, y_ref, atol=2e-2, rtol=2e-2), "mismatch vs reference"

    print("KERNEL_OK")
</pallas_src>

<mosaic_0001>
module attributes {stable_mosaic.version = 11 : i64} {
  func.func @_node_model_kernel(%arg0: i32, %arg1: memref<512x1xi32, #tpu.memory_space<vmem>>, %arg2: memref<1x512xi32, #tpu.memory_space<vmem>>, %arg3: memref<512x8xbf16, #tpu.memory_space<vmem>>, %arg4: memref<32x8xf32, #tpu.memory_space<vmem>>, %arg5: memref<32x1xi32, #tpu.memory_space<vmem>>, %arg6: memref<2x8xf32, #tpu.memory_space<vmem>>, %arg7: memref<8x32xf32, #tpu.memory_space<vmem>>, %arg8: memref<8x32xbf16, #tpu.memory_space<vmem>>, %arg9: memref<1x32xf32, #tpu.memory_space<vmem>>, %arg10: memref<32x128xbf16, #tpu.memory_space<vmem>>, %arg11: memref<1x128xf32, #tpu.memory_space<vmem>>, %arg12: memref<8x32xf32, #tpu.memory_space<vmem>>, %arg13: memref<128x32xf32, #tpu.memory_space<vmem>>, %arg14: memref<8x32xf32, #tpu.memory_space<vmem>>, %arg15: memref<1x32xf32, #tpu.memory_space<vmem>>, %arg16: memref<32x128xf32, #tpu.memory_space<vmem>>, %arg17: memref<1x128xf32, #tpu.memory_space<vmem>>, %arg18: memref<32x128xf32, #tpu.memory_space<vmem>>, %arg19: memref<32x128xf32, #tpu.memory_space<vmem>>, %arg20: memref<32x32xbf16, #tpu.memory_space<vmem>>) attributes {dimension_semantics = [#tpu.dimension_semantics<arbitrary>], iteration_bounds = array<i64: 1>, scalar_prefetch = 0 : i64, scratch_operands = 2 : i64, tpu.core_type = #tpu.core_type<tc>, window_params = [{transform_indices = @transform_0, window_bounds = array<i64: 512, 1>}, {transform_indices = @transform_1, window_bounds = array<i64: 1, 512>}, {transform_indices = @transform_2, window_bounds = array<i64: 512, 8>}, {pipeline_mode = #tpu.pipeline_mode<synchronous>, transform_indices = @transform_3, window_bounds = array<i64: 32, 8>}, {pipeline_mode = #tpu.pipeline_mode<synchronous>, transform_indices = @transform_4, window_bounds = array<i64: 32, 1>}, {pipeline_mode = #tpu.pipeline_mode<synchronous>, transform_indices = @transform_5, window_bounds = array<i64: 2, 8>}, {pipeline_mode = #tpu.pipeline_mode<synchronous>, transform_indices = @transform_6, window_bounds = array<i64: 8, 32>}, {pipeline_mode = #tpu.pipeline_mode<synchronous>, transform_indices = @transform_7, window_bounds = array<i64: 8, 32>}, {pipeline_mode = #tpu.pipeline_mode<synchronous>, transform_indices = @transform_8, window_bounds = array<i64: 1, 32>}, {pipeline_mode = #tpu.pipeline_mode<synchronous>, transform_indices = @transform_9, window_bounds = array<i64: 32, 128>}, {pipeline_mode = #tpu.pipeline_mode<synchronous>, transform_indices = @transform_10, window_bounds = array<i64: 1, 128>}, {pipeline_mode = #tpu.pipeline_mode<synchronous>, transform_indices = @transform_11, window_bounds = array<i64: 8, 32>}, {pipeline_mode = #tpu.pipeline_mode<synchronous>, transform_indices = @transform_12, window_bounds = array<i64: 128, 32>}, {pipeline_mode = #tpu.pipeline_mode<synchronous>, transform_indices = @transform_13, window_bounds = array<i64: 8, 32>}, {pipeline_mode = #tpu.pipeline_mode<synchronous>, transform_indices = @transform_14, window_bounds = array<i64: 1, 32>}, {pipeline_mode = #tpu.pipeline_mode<synchronous>, transform_indices = @transform_15, window_bounds = array<i64: 32, 128>}, {pipeline_mode = #tpu.pipeline_mode<synchronous>, transform_indices = @transform_16, window_bounds = array<i64: 1, 128>}, {pipeline_mode = #tpu.pipeline_mode<synchronous>, transform_indices = @transform_17, window_bounds = array<i64: 32, 128>}]} {
    %c0_i32 = arith.constant 0 : i32
    %0 = arith.cmpi eq, %arg0, %c0_i32 : i32
    %1 = arith.extui %0 : i1 to i32
    %c0_i32_0 = arith.constant 0 : i32
    %2 = arith.cmpi ne, %1, %c0_i32_0 : i32
    scf.if %2 {
      %cst_26 = arith.constant 0.000000e+00 : f32
      %42 = vector.broadcast %cst_26 : f32 to vector<32x128xf32>
      %c0_27 = arith.constant 0 : index
      %c0_28 = arith.constant 0 : index
      %43 = vector.load %arg19[%c0_27, %c0_28] : memref<32x128xf32, #tpu.memory_space<vmem>>, vector<32x128xf32>
      tpu.vector_store %arg19[%c0_27, %c0_28], %42 {strides = array<i32>} : memref<32x128xf32, #tpu.memory_space<vmem>>, vector<32x128xf32>,
      %c0_29 = arith.constant 0 : index
      %c0_30 = arith.constant 0 : index
      %44 = vector.load %arg4[%c0_29, %c0_30] : memref<32x8xf32, #tpu.memory_space<vmem>>, vector<32x8xf32>
      %c0_31 = arith.constant 0 : index
      %c0_32 = arith.constant 0 : index
      %45 = vector.load %arg7[%c0_31, %c0_32] : memref<8x32xf32, #tpu.memory_space<vmem>>, vector<8x32xf32>
      %cst_33 = arith.constant dense<0.000000e+00> : vector<32x32xf32>
      %46 = tpu.matmul %44, %45, %cst_33 {dimension_numbers = #tpu.dot_dimension_numbers<[1], [0], [0], [1], [0, 0, 1, 1], [], []>} : vector<32x8xf32>, vector<8x32xf32>, vector<32x32xf32> -> vector<32x32xf32>
      %47 = arith.truncf %46 : vector<32x32xf32> to vector<32x32xbf16>
      %c0_34 = arith.constant 0 : index
      %c0_35 = arith.constant 0 : index
      %48 = vector.load %arg20[%c0_34, %c0_35] : memref<32x32xbf16, #tpu.memory_space<vmem>>, vector<32x32xbf16>
      tpu.vector_store %arg20[%c0_34, %c0_35], %47 {strides = array<i32>} : memref<32x32xbf16, #tpu.memory_space<vmem>>, vector<32x32xbf16>,
    } else {
    }
    %c0 = arith.constant 0 : index
    %c0_1 = arith.constant 0 : index
    %3 = vector.load %arg1[%c0, %c0_1] : memref<512x1xi32, #tpu.memory_space<vmem>>, vector<512x1xi32>
    %c0_2 = arith.constant 0 : index
    %c0_3 = arith.constant 0 : index
    %4 = vector.load %arg2[%c0_2, %c0_3] : memref<1x512xi32, #tpu.memory_space<vmem>>, vector<1x512xi32>
    %5 = tpu.iota {dimensions = array<i32: 1>} : vector<512x32xi32>
    %6 = tpu.iota {dimensions = array<i32: 0>} : vector<32x512xi32>
    %7 = vector.broadcast %3 : vector<512x1xi32> to vector<512x32xi32>
    %8 = arith.cmpi eq, %5, %7 : vector<512x32xi32>
    %9 = arith.extui %8 : vector<512x32xi1> to vector<512x32xi32>
    %10 = arith.sitofp %9 : vector<512x32xi32> to vector<512x32xf32>
    %11 = arith.truncf %10 : vector<512x32xf32> to vector<512x32xbf16>
    %12 = vector.broadcast %4 : vector<1x512xi32> to vector<32x512xi32>
    %13 = arith.cmpi eq, %6, %12 : vector<32x512xi32>
    %14 = arith.extui %13 : vector<32x512xi1> to vector<32x512xi32>
    %15 = arith.sitofp %14 : vector<32x512xi32> to vector<32x512xf32>
    %16 = arith.truncf %15 : vector<32x512xf32> to vector<32x512xbf16>
    %c0_4 = arith.constant 0 : index
    %c0_5 = arith.constant 0 : index
    %17 = vector.load %arg20[%c0_4, %c0_5] : memref<32x32xbf16, #tpu.memory_space<vmem>>, vector<32x32xbf16>
    %cst = arith.constant dense<0.000000e+00> : vector<512x32xf32>
    %18 = tpu.matmul %11, %17, %cst {dimension_numbers = #tpu.dot_dimension_numbers<[1], [0], [0], [1], [0, 0, 1, 1], [], []>} : vector<512x32xbf16>, vector<32x32xbf16>, vector<512x32xf32> -> vector<512x32xf32>
    %c0_6 = arith.constant 0 : index
    %c0_7 = arith.constant 0 : index
    %19 = vector.load %arg3[%c0_6, %c0_7] : memref<512x8xbf16, #tpu.memory_space<vmem>>, vector<512x8xbf16>
    %c0_8 = arith.constant 0 : index
    %c0_9 = arith.constant 0 : index
    %20 = vector.load %arg8[%c0_8, %c0_9] : memref<8x32xbf16, #tpu.memory_space<vmem>>, vector<8x32xbf16>
    %cst_10 = arith.constant dense<0.000000e+00> : vector<512x32xf32>
    %21 = tpu.matmul %19, %20, %cst_10 {dimension_numbers = #tpu.dot_dimension_numbers<[1], [0], [0], [1], [0, 0, 1, 1], [], []>} : vector<512x8xbf16>, vector<8x32xbf16>, vector<512x32xf32> -> vector<512x32xf32>
    %22 = arith.addf %18, %21 : vector<512x32xf32>
    %c0_11 = arith.constant 0 : index
    %c0_12 = arith.constant 0 : index
    %23 = vector.load %arg9[%c0_11, %c0_12] : memref<1x32xf32, #tpu.memory_space<vmem>>, vector<1x32xf32>
    %24 = vector.broadcast %23 : vector<1x32xf32> to vector<512x32xf32>
    %25 = arith.addf %22, %24 : vector<512x32xf32>
    %cst_13 = arith.constant 0.000000e+00 : f32
    %26 = vector.broadcast %cst_13 : f32 to vector<512x32xf32>
    %27 = arith.maximumf %25, %26 : vector<512x32xf32>
    %28 = arith.truncf %27 : vector<512x32xf32> to vector<512x32xbf16>
    %c0_14 = arith.constant 0 : index
    %c0_15 = arith.constant 0 : index
    %29 = vector.load %arg10[%c0_14, %c0_15] : memref<32x128xbf16, #tpu.memory_space<vmem>>, vector<32x128xbf16>
    %cst_16 = arith.constant dense<0.000000e+00> : vector<512x128xf32>
    %30 = tpu.matmul %28, %29, %cst_16 {dimension_numbers = #tpu.dot_dimension_numbers<[1], [0], [0], [1], [0, 0, 1, 1], [], []>} : vector<512x32xbf16>, vector<32x128xbf16>, vector<512x128xf32> -> vector<512x128xf32>
    %c0_17 = arith.constant 0 : index
    %c0_18 = arith.constant 0 : index
    %31 = vector.load %arg11[%c0_17, %c0_18] : memref<1x128xf32, #tpu.memory_space<vmem>>, vector<1x128xf32>
    %32 = vector.broadcast %31 : vector<1x128xf32> to vector<512x128xf32>
    %33 = arith.addf %30, %32 : vector<512x128xf32>
    %c0_19 = arith.constant 0 : index
    %c0_20 = arith.constant 0 : index
    %34 = vector.load %arg19[%c0_19, %c0_20] : memref<32x128xf32, #tpu.memory_space<vmem>>, vector<32x128xf32>
    %35 = arith.truncf %33 : vector<512x128xf32> to vector<512x128xbf16>
    %cst_21 = arith.constant dense<0.000000e+00> : vector<32x128xf32>
    %36 = tpu.matmul %16, %35, %cst_21 {dimension_numbers = #tpu.dot_dimension_numbers<[1], [0], [0], [1], [0, 0, 1, 1], [], []>} : vector<32x512xbf16>, vector<512x128xbf16>, vector<32x128xf32> -> vector<32x128xf32>
    %37 = arith.addf %34, %36 : vector<32x128xf32>
    %c0_22 = arith.constant 0 : index
    %c0_23 = arith.constant 0 : index
    %38 = vector.load %arg19[%c0_22, %c0_23] : memref<32x128xf32, #tpu.memory_space<vmem>>, vector<32x128xf32>
    tpu.vector_store %arg19[%c0_22, %c0_23], %37 {strides = array<i32>} : memref<32x128xf32, #tpu.memory_space<vmem>>, vector<32x128xf32>,
    %c0_i32_24 = arith.constant 0 : i32
    %39 = arith.cmpi eq, %arg0, %c0_i32_24 : i32
    %40 = arith.extui %39 : i1 to i32
    %c0_i32_25 = arith.constant 0 : i32
    %41 = arith.cmpi ne, %40, %c0_i32_25 : i32
    scf.if %41 {
      %c0_26 = arith.constant 0 : index
      %c0_27 = arith.constant 0 : index
      %42 = vector.load %arg19[%c0_26, %c0_27] : memref<32x128xf32, #tpu.memory_space<vmem>>, vector<32x128xf32>
      %43 = vector.extract_strided_slice %42 {offsets = [0, 16], sizes = [32, 1], strides = [1, 1]} : vector<32x128xf32> to vector<32x1xf32>
      %cst_28 = arith.constant 1.000000e+00 : f32
      %44 = vector.broadcast %cst_28 : f32 to vector<32x1xf32>
      %45 = arith.maximumf %43, %44 : vector<32x1xf32>
      %46 = vector.broadcast %45 : vector<32x1xf32> to vector<32x128xf32>
      %47 = arith.divf %42, %46 : vector<32x128xf32>
      %c0_29 = arith.constant 0 : index
      %c0_30 = arith.constant 0 : index
      %48 = vector.load %arg6[%c0_29, %c0_30] : memref<2x8xf32, #tpu.memory_space<vmem>>, vector<2x8xf32>
      %c0_31 = arith.constant 0 : index
      %c0_32 = arith.constant 0 : index
      %49 = vector.load %arg14[%c0_31, %c0_32] : memref<8x32xf32, #tpu.memory_space<vmem>>, vector<8x32xf32>
      %cst_33 = arith.constant dense<0.000000e+00> : vector<2x32xf32>
      %50 = tpu.matmul %48, %49, %cst_33 {dimension_numbers = #tpu.dot_dimension_numbers<[1], [0], [0], [1], [0, 0, 1, 1], [], []>} : vector<2x8xf32>, vector<8x32xf32>, vector<2x32xf32> -> vector<2x32xf32>
      %51 = tpu.iota {dimensions = array<i32: 1>} : vector<32x2xi32>
      %c0_34 = arith.constant 0 : index
      %c0_35 = arith.constant 0 : index
      %52 = vector.load %arg5[%c0_34, %c0_35] : memref<32x1xi32, #tpu.memory_space<vmem>>, vector<32x1xi32>
      %53 = vector.broadcast %52 : vector<32x1xi32> to vector<32x2xi32>
      %54 = arith.cmpi eq, %51, %53 : vector<32x2xi32>
      %55 = arith.extui %54 : vector<32x2xi1> to vector<32x2xi32>
      %56 = arith.sitofp %55 : vector<32x2xi32> to vector<32x2xf32>
      %c0_36 = arith.constant 0 : index
      %c0_37 = arith.constant 0 : index
      %57 = vector.load %arg4[%c0_36, %c0_37] : memref<32x8xf32, #tpu.memory_space<vmem>>, vector<32x8xf32>
      %c0_38 = arith.constant 0 : index
      %c0_39 = arith.constant 0 : index
      %58 = vector.load %arg12[%c0_38, %c0_39] : memref<8x32xf32, #tpu.memory_space<vmem>>, vector<8x32xf32>
      %cst_40 = arith.constant dense<0.000000e+00> : vector<32x32xf32>
      %59 = tpu.matmul %57, %58, %cst_40 {dimension_numbers = #tpu.dot_dimension_numbers<[1], [0], [0], [1], [0, 0, 1, 1], [], []>} : vector<32x8xf32>, vector<8x32xf32>, vector<32x32xf32> -> vector<32x32xf32>
      %c0_41 = arith.constant 0 : index
      %c0_42 = arith.constant 0 : index
      %60 = vector.load %arg13[%c0_41, %c0_42] : memref<128x32xf32, #tpu.memory_space<vmem>>, vector<128x32xf32>
      %cst_43 = arith.constant dense<0.000000e+00> : vector<32x32xf32>
      %61 = tpu.matmul %47, %60, %cst_43 {dimension_numbers = #tpu.dot_dimension_numbers<[1], [0], [0], [1], [0, 0, 1, 1], [], []>} : vector<32x128xf32>, vector<128x32xf32>, vector<32x32xf32> -> vector<32x32xf32>
      %62 = arith.addf %59, %61 : vector<32x32xf32>
      %cst_44 = arith.constant dense<0.000000e+00> : vector<32x32xf32>
      %63 = tpu.matmul %56, %50, %cst_44 {dimension_numbers = #tpu.dot_dimension_numbers<[1], [0], [0], [1], [0, 0, 1, 1], [], []>} : vector<32x2xf32>, vector<2x32xf32>, vector<32x32xf32> -> vector<32x32xf32>
      %64 = arith.addf %62, %63 : vector<32x32xf32>
      %c0_45 = arith.constant 0 : index
      %c0_46 = arith.constant 0 : index
      %65 = vector.load %arg15[%c0_45, %c0_46] : memref<1x32xf32, #tpu.memory_space<vmem>>, vector<1x32xf32>
      %66 = vector.broadcast %65 : vector<1x32xf32> to vector<32x32xf32>
      %67 = arith.addf %64, %66 : vector<32x32xf32>
      %cst_47 = arith.constant 0.000000e+00 : f32
      %68 = vector.broadcast %cst_47 : f32 to vector<32x32xf32>
      %69 = arith.maximumf %67, %68 : vector<32x32xf32>
      %c0_48 = arith.constant 0 : index
      %c0_49 = arith.constant 0 : index
      %70 = vector.load %arg16[%c0_48, %c0_49] : memref<32x128xf32, #tpu.memory_space<vmem>>, vector<32x128xf32>
      %cst_50 = arith.constant dense<0.000000e+00> : vector<32x128xf32>
      %71 = tpu.matmul %69, %70, %cst_50 {dimension_numbers = #tpu.dot_dimension_numbers<[1], [0], [0], [1], [0, 0, 1, 1], [], []>} : vector<32x32xf32>, vector<32x128xf32>, vector<32x128xf32> -> vector<32x128xf32>
      %c0_51 = arith.constant 0 : index
      %c0_52 = arith.constant 0 : index
      %72 = vector.load %arg17[%c0_51, %c0_52] : memref<1x128xf32, #tpu.memory_space<vmem>>, vector<1x128xf32>
      %73 = vector.broadcast %72 : vector<1x128xf32> to vector<32x128xf32>
      %74 = arith.addf %71, %73 : vector<32x128xf32>
      %c0_53 = arith.constant 0 : index
      %c0_54 = arith.constant 0 : index
      %75 = vector.load %arg18[%c0_53, %c0_54] : memref<32x128xf32, #tpu.memory_space<vmem>>, vector<32x128xf32>
      tpu.vector_store %arg18[%c0_53, %c0_54], %74 {strides = array<i32>} : memref<32x128xf32, #tpu.memory_space<vmem>>, vector<32x128xf32>,
    } else {
    }
    return
  }
  func.func @transform_0(%arg0: i32) -> (i32, i32) {
    %c0_i32 = arith.constant 0 : i32
    %c0_i32_0 = arith.constant 0 : i32
    return %arg0, %c0_i32 : i32, i32
  }
  func.func @transform_1(%arg0: i32) -> (i32, i32) {
    %c0_i32 = arith.constant 0 : i32
    %c0_i32_0 = arith.constant 0 : i32
    return %c0_i32, %arg0 : i32, i32
  }
  func.func @transform_2(%arg0: i32) -> (i32, i32) {
    %c0_i32 = arith.constant 0 : i32
    %c0_i32_0 = arith.constant 0 : i32
    return %arg0, %c0_i32 : i32, i32
  }
  func.func @transform_3(%arg0: i32) -> (i32, i32) {
    %c0_i32 = arith.constant 0 : i32
    %c0_i32_0 = arith.constant 0 : i32
    %c0_i32_1 = arith.constant 0 : i32
    return %c0_i32, %c0_i32_0 : i32, i32
  }
  func.func @transform_4(%arg0: i32) -> (i32, i32) {
    %c0_i32 = arith.constant 0 : i32
    %c0_i32_0 = arith.constant 0 : i32
    %c0_i32_1 = arith.constant 0 : i32
    return %c0_i32, %c0_i32_0 : i32, i32
  }
  func.func @transform_5(%arg0: i32) -> (i32, i32) {
    %c0_i32 = arith.constant 0 : i32
    %c0_i32_0 = arith.constant 0 : i32
    %c0_i32_1 = arith.constant 0 : i32
    return %c0_i32, %c0_i32_0 : i32, i32
  }
  func.func @transform_6(%arg0: i32) -> (i32, i32) {
    %c0_i32 = arith.constant 0 : i32
    %c0_i32_0 = arith.constant 0 : i32
    %c0_i32_1 = arith.constant 0 : i32
    return %c0_i32, %c0_i32_0 : i32, i32
  }
  func.func @transform_7(%arg0: i32) -> (i32, i32) {
    %c0_i32 = arith.constant 0 : i32
    %c0_i32_0 = arith.constant 0 : i32
    %c0_i32_1 = arith.constant 0 : i32
    return %c0_i32, %c0_i32_0 : i32, i32
  }
  func.func @transform_8(%arg0: i32) -> (i32, i32) {
    %c0_i32 = arith.constant 0 : i32
    %c0_i32_0 = arith.constant 0 : i32
    %c0_i32_1 = arith.constant 0 : i32
    return %c0_i32, %c0_i32_0 : i32, i32
  }
  func.func @transform_9(%arg0: i32) -> (i32, i32) {
    %c0_i32 = arith.constant 0 : i32
    %c0_i32_0 = arith.constant 0 : i32
    %c0_i32_1 = arith.constant 0 : i32
    return %c0_i32, %c0_i32_0 : i32, i32
  }
  func.func @transform_10(%arg0: i32) -> (i32, i32) {
    %c0_i32 = arith.constant 0 : i32
    %c0_i32_0 = arith.constant 0 : i32
    %c0_i32_1 = arith.constant 0 : i32
    return %c0_i32, %c0_i32_0 : i32, i32
  }
  func.func @transform_11(%arg0: i32) -> (i32, i32) {
    %c0_i32 = arith.constant 0 : i32
    %c0_i32_0 = arith.constant 0 : i32
    %c0_i32_1 = arith.constant 0 : i32
    return %c0_i32, %c0_i32_0 : i32, i32
  }
  func.func @transform_12(%arg0: i32) -> (i32, i32) {
    %c0_i32 = arith.constant 0 : i32
    %c0_i32_0 = arith.constant 0 : i32
    %c0_i32_1 = arith.constant 0 : i32
    return %c0_i32, %c0_i32_0 : i32, i32
  }
  func.func @transform_13(%arg0: i32) -> (i32, i32) {
    %c0_i32 = arith.constant 0 : i32
    %c0_i32_0 = arith.constant 0 : i32
    %c0_i32_1 = arith.constant 0 : i32
    return %c0_i32, %c0_i32_0 : i32, i32
  }
  func.func @transform_14(%arg0: i32) -> (i32, i32) {
    %c0_i32 = arith.constant 0 : i32
    %c0_i32_0 = arith.constant 0 : i32
    %c0_i32_1 = arith.constant 0 : i32
    return %c0_i32, %c0_i32_0 : i32, i32
  }
  func.func @transform_15(%arg0: i32) -> (i32, i32) {
    %c0_i32 = arith.constant 0 : i32
    %c0_i32_0 = arith.constant 0 : i32
    %c0_i32_1 = arith.constant 0 : i32
    return %c0_i32, %c0_i32_0 : i32, i32
  }
  func.func @transform_16(%arg0: i32) -> (i32, i32) {
    %c0_i32 = arith.constant 0 : i32
    %c0_i32_0 = arith.constant 0 : i32
    %c0_i32_1 = arith.constant 0 : i32
    return %c0_i32, %c0_i32_0 : i32, i32
  }
  func.func @transform_17(%arg0: i32) -> (i32, i32) {
    %c0_i32 = arith.constant 0 : i32
    %c0_i32_0 = arith.constant 0 : i32
    %c0_i32_1 = arith.constant 0 : i32
    return %c0_i32, %c0_i32_0 : i32, i32
  }
}

</mosaic_0001>

<bundles_post_ra>
// kernel: tpu_custom_call.1
= control target key start
LH: loop header
LB: loop body
LE: loop exit
PB: predicated region body
PF: predicated region fallthrough
CT: control target
= control target key end

     0   :  { %s5078_s0 = inlined_call_operand.vmem [shape: s32[512,1], index: 0, kind: input, shape index: {}]   ;;  %s5079_s1 = inlined_call_operand.vmem [shape: s32[1,512], index: 1, kind: input, shape index: {}]   ;;  %s5080_s2 = inlined_call_operand.vmem [shape: bf16[512,8], index: 2, kind: input, shape index: {}]   ;;  %s5081_s3 = inlined_call_operand.vmem [shape: f32[32,8], index: 3, kind: input, shape index: {}]   ;;  %s5082_s4 = inlined_call_operand.vmem [shape: s32[32,1], index: 4, kind: input, shape index: {}]   ;;  %s5083_s5 = inlined_call_operand.vmem [shape: f32[2,8], index: 5, kind: input, shape index: {}]   ;;  %s5084_s6 = inlined_call_operand.vmem [shape: f32[8,32], index: 6, kind: input, shape index: {}]   ;;  %s5085_s7 = inlined_call_operand.vmem [shape: bf16[8,32], index: 7, kind: input, shape index: {}]   ;;  %s5086_s8 = inlined_call_operand.vmem [shape: f32[1,32], index: 8, kind: input, shape index: {}]   ;;  %s5087_s9 = inlined_call_operand.vmem [shape: bf16[32,128], index: 9, kind: input, shape index: {}]   ;;  %s5088_s10 = inlined_call_operand.vmem [shape: f32[1,128], index: 10, kind: input, shape index: {}]   ;;  %s5089_s11 = inlined_call_operand.vmem [shape: f32[8,32], index: 11, kind: input, shape index: {}]   ;;  %s5090_s12 = inlined_call_operand.vmem [shape: f32[128,32], index: 12, kind: input, shape index: {}]   ;;  %s5091_s13 = inlined_call_operand.vmem [shape: f32[8,32], index: 13, kind: input, shape index: {}]   ;;  %s5092_s14 = inlined_call_operand.vmem [shape: f32[1,32], index: 14, kind: input, shape index: {}]   ;;  %s5093_s15 = inlined_call_operand.vmem [shape: f32[32,128], index: 15, kind: input, shape index: {}]   ;;  %s5094_s16 = inlined_call_operand.vmem [shape: f32[1,128], index: 16, kind: input, shape index: {}]   ;;  %s5095_s17 = inlined_call_operand.hbm [shape: f32[32,128], index: 17, kind: output, shape index: {}]  }
   0x1   :  { %5097 = sst [smem:[#allocation7_spill]] %s5078_s0 }
   0x2   :  { %5098 = sst [smem:[#allocation8_spill]] %s5079_s1 }
   0x3   :  { %v70_v0 = vld [vmem:[%s5084_s6] sm:$0xff]  ;;  %vm71_vm0 = vcmask 64512   ;;  %v67_v2 = vld [vmem:[%s5081_s3 + $0x8] sm:$0xff]  ;;  %v68_v3 = vld [vmem:[%s5081_s3 + $0x10] sm:$0xff]  ;;  %s5099_s1 = sld [smem:[#allocation7_spill]]  ;;  %v3978_v5 = vmov 0  }
   0x4   :  { %v66_v1 = vld [vmem:[%s5081_s3] sm:$0xff]  ;;  %3502 = vmatprep.subr.mxu0 %v70_v0  ;;  %3907 = vset.pattern.permute.xlu1 %v3978_v5  ;;  %v69_v7 = vld [vmem:[%s5081_s3 + $0x18] sm:$0xff]  ;;  %vm1058_vm1 = vcmask 1043456   ;;  %v3913_v19 = vld [vmem:[%s5080_s2 + $0x8] sm:$0xff]  }
   0x5   :  { %3504 = vmatprep.mubr.msk.f32.mxu0 %vm71_vm0, %v66_v1  ;;  %3503 = vmatpush3.msra.mxu0 %v70_v0  ;;  %v800_v13 = vld [vmem:[%s5085_s7] sm:$0xf]  ;;  %v3914_v20 = vld [vmem:[%s5080_s2 + $0x10] sm:$0xff]   ;;  %v3915_v23 = vld [vmem:[%s5080_s2 + $0x18] sm:$0xff]  }
   0x6   :  { %3505 = vmatmul.mubr.msk.f32.vlgmr.msra.gmra.mrb[0].mxu0 %vm71_vm0, %v67_v2  ;;  %3906 = vset.pattern.permute.xlu0 %v3978_v5  ;;  %v1060_v15 = vsel %vm1058_vm1, %v800_v13, 0  ;;  %v3912_v16 = vld [vmem:[%s5080_s2] sm:$0xff]   ;;  %v3917_v29 = vld [vmem:[%s5080_s2 + $0x28] sm:$0xff]   ;;  %v3918_v30 = vld [vmem:[%s5080_s2 + $0x30] sm:$0xff]  }
   0x7   :  { %3507 = vmatprep.mubr.msk.f32.mxu0 %vm71_vm0, %v68_v3  ;;  %3897 = vmatprep.subr.msk.bf16.mxu1 %vm1058_vm1, %v800_v13  ;;  %v3916_v24 = vld [vmem:[%s5080_s2 + $0x20] sm:$0xff]   ;;  %v3919_v35 = vld [vmem:[%s5080_s2 + $0x38] sm:$0xff]   ;;  %v3921_v41 = vld [vmem:[%s5080_s2 + $0x48] sm:$0xff]  }
   0x8   :  { %3511 = vmatpush3.bf16.msra.mxu1 %v1060_v15  ;;  %3512 = vmatprep.mubr.msk.bf16.mxu1 %vm71_vm0, %v3912_v16  ;;  %v3920_v36 = vld [vmem:[%s5080_s2 + $0x40] sm:$0xff]   ;;  %v3922_v43 = vld [vmem:[%s5080_s2 + $0x50] sm:$0xff]  }
   0x9   :  { %v176_v4 = vld [vmem:[%s5099_s1 + $0x10] sm:$0xff]  ;;  %v174_v6 = vld [vmem:[%s5099_s1] sm:$0xff]  ;;  %v177_v8 = vld [vmem:[%s5099_s1 + $0x18] sm:$0xff] }
   0xa   :  { %253 = vperm.xlu1 %3907, %v176_v4   ;;  %247 = vperm.xlu0 %3906, %v174_v6   ;;  %v175_v9 = vld [vmem:[%s5099_s1 + $0x8] sm:$0xff]  ;;  %v178_v11 = vld [vmem:[%s5099_s1 + $0x20] sm:$0xff]  ;;  %v181_v12 = vld [vmem:[%s5099_s1 + $0x38] sm:$0xff] }
   0xb   :  { %3508 = vmatmul.mubr.msk.f32.gmra.mrb[2].mxu0 %vm71_vm0, %v69_v7  ;;  %v179_v10 = vld [vmem:[%s5099_s1 + $0x28] sm:$0xff]  ;;  %v180_v14 = vld [vmem:[%s5099_s1 + $0x30] sm:$0xff]  ;;  %v182_v18 = vld [vmem:[%s5099_s1 + $0x40] sm:$0xff]  ;;  %3513 = vmatmul.mubr.msk.bf16.vlgmr.msra.gmra.mrb[0].mxu1 %vm71_vm0, %v3913_v19 }
   0xc   :  { %v183_v17 = vld [vmem:[%s5099_s1 + $0x48] sm:$0xff]  ;;  %3516 = vmatprep.mubr.msk.bf16.mxu1 %vm71_vm0, %v3914_v20  ;;  %v185_v21 = vld [vmem:[%s5099_s1 + $0x58] sm:$0xff]  ;;  %v184_v22 = vld [vmem:[%s5099_s1 + $0x50] sm:$0xff] }
   0xd   :  { %v187_v25 = vld [vmem:[%s5099_s1 + $0x68] sm:$0xff]  ;;  %v186_v26 = vld [vmem:[%s5099_s1 + $0x60] sm:$0xff]  ;;  %v189_v27 = vld [vmem:[%s5099_s1 + $0x78] sm:$0xff] }
   0xe   :  { %256 = vperm.xlu1 %3907, %v177_v8   ;;  %250 = vperm.xlu0 %3906, %v175_v9   ;;  %v188_v28 = vld [vmem:[%s5099_s1 + $0x70] sm:$0xff]  ;;  %v191_v31 = vld [vmem:[%s5099_s1 + $0x88] sm:$0xff]  ;;  %v190_v32 = vld [vmem:[%s5099_s1 + $0x80] sm:$0xff] }
   0xf   :  { %v193_v33 = vld [vmem:[%s5099_s1 + $0x98] sm:$0xff]  ;;  %v192_v34 = vld [vmem:[%s5099_s1 + $0x90] sm:$0xff]  ;;  %v195_v37 = vld [vmem:[%s5099_s1 + $0xa8] sm:$0xff] }
  0x10   :  { %v194_v38 = vld [vmem:[%s5099_s1 + $0xa0] sm:$0xff]  ;;  %v197_v39 = vld [vmem:[%s5099_s1 + $0xb8] sm:$0xff]  ;;  %v196_v40 = vld [vmem:[%s5099_s1 + $0xb0] sm:$0xff] }
  0x11   :  { %v199_v42 = vld [vmem:[%s5099_s1 + $0xc8] sm:$0xff]  ;;  %v198_v44 = vld [vmem:[%s5099_s1 + $0xc0] sm:$0xff]  ;;  %v201_v45 = vld [vmem:[%s5099_s1 + $0xd8] sm:$0xff] }
  0x12   :  { %262 = vperm.xlu1 %3907, %v179_v10   ;;  %259 = vperm.xlu0 %3906, %v178_v11   ;;  %v200_v46 = vld [vmem:[%s5099_s1 + $0xd0] sm:$0xff] }
  0x13   :  { %3517 = vmatmul.mubr.msk.bf16.gmra.mrb[4].mxu1 %vm71_vm0, %v3915_v23 }
  0x14   :  { %3520 = vmatprep.mubr.msk.bf16.mxu1 %vm71_vm0, %v3916_v24 }
  0x16   :  { %268 = vperm.xlu1 %3907, %v181_v12   ;;  %265 = vperm.xlu0 %3906, %v180_v14  }
  0x1a   :  { %274 = vperm.xlu1 %3907, %v183_v17   ;;  %271 = vperm.xlu0 %3906, %v182_v18  }
  0x1b   :  { %3521 = vmatmul.mubr.msk.bf16.gmra.mrb[8].mxu1 %vm71_vm0, %v3917_v29 }
  0x1c   :  { %3524 = vmatprep.mubr.msk.bf16.mxu1 %vm71_vm0, %v3918_v30 }
  0x1e   :  { %280 = vperm.xlu1 %3907, %v185_v21   ;;  %277 = vperm.xlu0 %3906, %v184_v22  }
  0x22   :  { %286 = vperm.xlu1 %3907, %v187_v25   ;;  %283 = vperm.xlu0 %3906, %v186_v26  }
  0x23   :  { %3525 = vmatmul.mubr.msk.bf16.gmra.mrb[12].mxu1 %vm71_vm0, %v3919_v35 }
  0x24   :  { %3528 = vmatprep.mubr.msk.bf16.mxu1 %vm71_vm0, %v3920_v36 }
  0x26   :  { %292 = vperm.xlu1 %3907, %v189_v27   ;;  %289 = vperm.xlu0 %3906, %v188_v28  }
  0x2a   :  { %298 = vperm.xlu1 %3907, %v191_v31   ;;  %295 = vperm.xlu0 %3906, %v190_v32  }
  0x2b   :  { %3529 = vmatmul.mubr.msk.bf16.gmra.mrb[16].mxu1 %vm71_vm0, %v3921_v41 }
  0x2c   :  { %3532 = vmatprep.mubr.msk.bf16.mxu1 %vm71_vm0, %v3922_v43 }
  0x2e   :  { %304 = vperm.xlu1 %3907, %v193_v33   ;;  %301 = vperm.xlu0 %3906, %v192_v34  }
  0x32   :  { %310 = vperm.xlu1 %3907, %v195_v37   ;;  %307 = vperm.xlu0 %3906, %v194_v38  }
  0x36   :  { %316 = vperm.xlu1 %3907, %v197_v39   ;;  %313 = vperm.xlu0 %3906, %v196_v40  }
  0x3a   :  { %322 = vperm.xlu1 %3907, %v199_v42   ;;  %319 = vperm.xlu0 %3906, %v198_v44  }
  0x3b   :  { %22 = vsyncpa [#allocation5], 0  ;;  %v3923_v47 = vld [vmem:[%s5080_s2 + $0x58] sm:$0xff]   ;;  %v3924_v48 = vld [vmem:[%s5080_s2 + $0x60] sm:$0xff]   ;;  %v239_v37 = vlaneseq  ;;  %v3979_v44 = vmov 0.0   ;;  %vm171_vm4 = vcmask 261120  }
  0x3c   :  { %v203_v49 = vld [vmem:[%s5099_s1 + $0xe8] sm:$0xff]  ;;  %v202_v50 = vld [vmem:[%s5099_s1 + $0xe0] sm:$0xff]  ;;  %3533 = vmatmul.mubr.msk.bf16.gmra.mrb[20].mxu1 %vm71_vm0, %v3923_v47  ;;  %v205_v51 = vld [vmem:[%s5099_s1 + $0xf8] sm:$0xff]  ;;  %s5100_s26 = sld [smem:[#allocation8_spill]]  ;;  %s3983_s22 = smov [#allocation4]  }
  0x3d   :  { %3536 = vmatprep.mubr.msk.bf16.mxu1 %vm71_vm0, %v3924_v48  ;;  %v204_v52 = vld [vmem:[%s5099_s1 + $0xf0] sm:$0xff]  ;;  %v3925_v53 = vld [vmem:[%s5080_s2 + $0x68] sm:$0xff]   ;;  %v206_v56 = vld [vmem:[%s5099_s1 + $0x100] sm:$0xff]  ;;  %v4415_v41 = vand.u32 127, %v239_v37  ;;  %s3037_s23 = sshll.u32 %s3983_s22, 4  ;;  %s3038_s23 = int_to_ptr.vmem [resolvable:$true] %s3037_s23 }
  0x3e   :  { %328 = vperm.xlu1 %3907, %v201_v45   ;;  %325 = vperm.xlu0 %3906, %v200_v46   ;;  %v3926_v54 = vld [vmem:[%s5080_s2 + $0x70] sm:$0xff]   ;;  %v207_v55 = vld [vmem:[%s5099_s1 + $0x108] sm:$0xff]  ;;  %v209_v57 = vld [vmem:[%s5099_s1 + $0x118] sm:$0xff]  ;;  %p3959_p1 = scmp.lt.s32.totalorder %s3038_s23, %s3038_s23 }
  0x3f   :  { %v208_v58 = vld [vmem:[%s5099_s1 + $0x110] sm:$0xff]  ;;  %v3927_v59 = vld [vmem:[%s5080_s2 + $0x78] sm:$0xff]   ;;  %v3928_v60 = vld [vmem:[%s5080_s2 + $0x80] sm:$0xff]  }
  0x40   :  { %v211_v61 = vld [vmem:[%s5099_s1 + $0x128] sm:$0xff]  ;;  %v210_v62 = vld [vmem:[%s5099_s1 + $0x120] sm:$0xff]  ;;  %v213_v63 = vld [vmem:[%s5099_s1 + $0x138] sm:$0xff] }
  0x41   :  { %v212_v0 = vld [vmem:[%s5099_s1 + $0x130] sm:$0xff]  ;;  %v3929_v1 = vld [vmem:[%s5080_s2 + $0x88] sm:$0xff]   ;;  %v214_v4 = vld [vmem:[%s5099_s1 + $0x140] sm:$0xff] }
  0x42   :  { %334 = vperm.xlu1 %3907, %v203_v49   ;;  %331 = vperm.xlu0 %3906, %v202_v50   ;;  %v3930_v2 = vld [vmem:[%s5080_s2 + $0x90] sm:$0xff]   ;;  %v215_v3 = vld [vmem:[%s5099_s1 + $0x148] sm:$0xff]  ;;  %v217_v6 = vld [vmem:[%s5099_s1 + $0x158] sm:$0xff] }
  0x43   :  { %v216_v7 = vld [vmem:[%s5099_s1 + $0x150] sm:$0xff]  ;;  %v3931_v8 = vld [vmem:[%s5080_s2 + $0x98] sm:$0xff]   ;;  %v3932_v9 = vld [vmem:[%s5080_s2 + $0xa0] sm:$0xff]  }
  0x44   :  { %3537 = vmatmul.mubr.msk.bf16.gmra.mrb[24].mxu1 %vm71_vm0, %v3925_v53  ;;  %v219_v10 = vld [vmem:[%s5099_s1 + $0x168] sm:$0xff]  ;;  %v218_v11 = vld [vmem:[%s5099_s1 + $0x160] sm:$0xff]  ;;  %v221_v12 = vld [vmem:[%s5099_s1 + $0x178] sm:$0xff] }
  0x45   :  { %3540 = vmatprep.mubr.msk.bf16.mxu1 %vm71_vm0, %v3926_v54  ;;  %v220_v13 = vld [vmem:[%s5099_s1 + $0x170] sm:$0xff]  ;;  %v3933_v14 = vld [vmem:[%s5080_s2 + $0xa8] sm:$0xff]   ;;  %v222_v17 = vld [vmem:[%s5099_s1 + $0x180] sm:$0xff] }
  0x46   :  { %340 = vperm.xlu1 %3907, %v205_v51   ;;  %337 = vperm.xlu0 %3906, %v204_v52   ;;  %v3934_v15 = vld [vmem:[%s5080_s2 + $0xb0] sm:$0xff]   ;;  %v223_v16 = vld [vmem:[%s5099_s1 + $0x188] sm:$0xff]  ;;  %v225_v18 = vld [vmem:[%s5099_s1 + $0x198] sm:$0xff] }
  0x47   :  { %v224_v19 = vld [vmem:[%s5099_s1 + $0x190] sm:$0xff]  ;;  %v3935_v20 = vld [vmem:[%s5080_s2 + $0xb8] sm:$0xff]   ;;  %v3936_v21 = vld [vmem:[%s5080_s2 + $0xc0] sm:$0xff]  }
  0x48   :  { %v227_v22 = vld [vmem:[%s5099_s1 + $0x1a8] sm:$0xff]  ;;  %v226_v23 = vld [vmem:[%s5099_s1 + $0x1a0] sm:$0xff]  ;;  %v229_v24 = vld [vmem:[%s5099_s1 + $0x1b8] sm:$0xff] }
  0x49   :  { %v228_v25 = vld [vmem:[%s5099_s1 + $0x1b0] sm:$0xff]  ;;  %v3937_v26 = vld [vmem:[%s5080_s2 + $0xc8] sm:$0xff]   ;;  %v230_v29 = vld [vmem:[%s5099_s1 + $0x1c0] sm:$0xff] }
  0x4a   :  { %346 = vperm.xlu1 %3907, %v207_v55   ;;  %343 = vperm.xlu0 %3906, %v206_v56   ;;  %v3938_v27 = vld [vmem:[%s5080_s2 + $0xd0] sm:$0xff]   ;;  %v231_v28 = vld [vmem:[%s5099_s1 + $0x1c8] sm:$0xff]  ;;  %v233_v30 = vld [vmem:[%s5099_s1 + $0x1d8] sm:$0xff] }
  0x4b   :  { %v232_v31 = vld [vmem:[%s5099_s1 + $0x1d0] sm:$0xff]  ;;  %v3939_v32 = vld [vmem:[%s5080_s2 + $0xd8] sm:$0xff]   ;;  %v3940_v33 = vld [vmem:[%s5080_s2 + $0xe0] sm:$0xff]  }
  0x4c   :  { %3541 = vmatmul.mubr.msk.bf16.gmra.mrb[28].mxu1 %vm71_vm0, %v3927_v59  ;;  %v235_v34 = vld [vmem:[%s5099_s1 + $0x1e8] sm:$0xff]  ;;  %v234_v35 = vld [vmem:[%s5099_s1 + $0x1e0] sm:$0xff]  ;;  %v237_v36 = vld [vmem:[%s5099_s1 + $0x1f8] sm:$0xff] }
  0x4d   :  { %3544 = vmatprep.mubr.msk.bf16.mxu1 %vm71_vm0, %v3928_v60  ;;  %v236_v38 = vld [vmem:[%s5099_s1 + $0x1f0] sm:$0xff]  ;;  %v3941_v39 = vld [vmem:[%s5080_s2 + $0xe8] sm:$0xff]   ;;  %v3943_v43 = vld [vmem:[%s5080_s2 + $0xf8] sm:$0xff]  }
  0x4e   :  { %352 = vperm.xlu1 %3907, %v209_v57   ;;  %349 = vperm.xlu0 %3906, %v208_v58   ;;  %v3942_v40 = vld [vmem:[%s5080_s2 + $0xf0] sm:$0xff]  }
  0x52   :  { %358 = vperm.xlu1 %3907, %v211_v61   ;;  %355 = vperm.xlu0 %3906, %v210_v62  }
  0x54   :  { %3545 = vmatmul.mubr.msk.bf16.gmra.mrb[32].mxu1 %vm71_vm0, %v3929_v1 }
  0x55   :  { %3548 = vmatprep.mubr.msk.bf16.mxu1 %vm71_vm0, %v3930_v2 }
  0x56   :  { %364 = vperm.xlu1 %3907, %v213_v63   ;;  %361 = vperm.xlu0 %3906, %v212_v0  }
  0x5a   :  { %370 = vperm.xlu1 %3907, %v215_v3   ;;  %367 = vperm.xlu0 %3906, %v214_v4  }
  0x5c   :  { %3549 = vmatmul.mubr.msk.bf16.gmra.mrb[36].mxu1 %vm71_vm0, %v3931_v8 }
  0x5d   :  { %3552 = vmatprep.mubr.msk.bf16.mxu1 %vm71_vm0, %v3932_v9 }
  0x5e   :  { %376 = vperm.xlu1 %3907, %v217_v6   ;;  %373 = vperm.xlu0 %3906, %v216_v7  }
  0x62   :  { %382 = vperm.xlu1 %3907, %v219_v10   ;;  %379 = vperm.xlu0 %3906, %v218_v11  }
  0x64   :  { %3553 = vmatmul.mubr.msk.bf16.gmra.mrb[40].mxu1 %vm71_vm0, %v3933_v14 }
  0x65   :  { %3556 = vmatprep.mubr.msk.bf16.mxu1 %vm71_vm0, %v3934_v15 }
  0x66   :  { %388 = vperm.xlu1 %3907, %v221_v12   ;;  %385 = vperm.xlu0 %3906, %v220_v13  }
  0x6a   :  { %394 = vperm.xlu1 %3907, %v223_v16   ;;  %391 = vperm.xlu0 %3906, %v222_v17  }
  0x6c   :  { %3557 = vmatmul.mubr.msk.bf16.gmra.mrb[44].mxu1 %vm71_vm0, %v3935_v20 }
  0x6d   :  { %3560 = vmatprep.mubr.msk.bf16.mxu1 %vm71_vm0, %v3936_v21 }
  0x6e   :  { %400 = vperm.xlu1 %3907, %v225_v18   ;;  %397 = vperm.xlu0 %3906, %v224_v19  }
  0x72   :  { %406 = vperm.xlu1 %3907, %v227_v22   ;;  %403 = vperm.xlu0 %3906, %v226_v23  }
  0x74   :  { %3561 = vmatmul.mubr.msk.bf16.gmra.mrb[48].mxu1 %vm71_vm0, %v3937_v26 }
  0x75   :  { %3564 = vmatprep.mubr.msk.bf16.mxu1 %vm71_vm0, %v3938_v27 }
  0x76   :  { %412 = vperm.xlu1 %3907, %v229_v24   ;;  %409 = vperm.xlu0 %3906, %v228_v25  }
  0x7a   :  { %418 = vperm.xlu1 %3907, %v231_v28   ;;  %415 = vperm.xlu0 %3906, %v230_v29  }
  0x7c   :  { %3565 = vmatmul.mubr.msk.bf16.gmra.mrb[52].mxu1 %vm71_vm0, %v3939_v32 }
  0x7d   :  { %3568 = vmatprep.mubr.msk.bf16.mxu1 %vm71_vm0, %v3940_v33 }
  0x7e   :  { %424 = vperm.xlu1 %3907, %v233_v30   ;;  %421 = vperm.xlu0 %3906, %v232_v31  }
  0x82   :  { %430 = vperm.xlu1 %3907, %v235_v34   ;;  %427 = vperm.xlu0 %3906, %v234_v35  }
  0x84   :  { %3569 = vmatmul.mubr.msk.bf16.gmra.mrb[56].mxu1 %vm71_vm0, %v3941_v39 }
  0x85   :  { %3572 = vmatprep.mubr.msk.bf16.mxu1 %vm71_vm0, %v3942_v40 }
  0x86   :  { %436 = vperm.xlu1 %3907, %v237_v36   ;;  %433 = vperm.xlu0 %3906, %v236_v38  }
  0x89   :  { %v248_v42 = vpop.permute.xlu0 %247  ;;  %v254_v49 = vpop.permute.xlu1 %253 }
  0x8a   :  { %vm438_vm2 = vcmp.eq.s32.totalorder %v4415_v41, %v248_v42  ;;  %vm440_vm5 = vcmp.eq.s32.totalorder %v4415_v41, %v254_v49 }
  0x8b   :  { %v3052_v45 = vsel %vm438_vm2, 1.0, %v3979_v44  ;;  %v3054_v17 = vsel %vm440_vm5, 1.0, %v3979_v44 }
  0x8c   :  { %3573 = vmatmul.mubr.msk.bf16.gmra.mrb[60].mxu1 %vm71_vm0, %v3943_v43 }
  0x8d   :  { %v251_v46 = vpop.permute.xlu0 %250  ;;  %v257_v50 = vpop.permute.xlu1 %256 }
  0x8e   :  { %vm439_vm3 = vcmp.eq.s32.totalorder %v4415_v41, %v251_v46  ;;  %vm441_vm6 = vcmp.eq.s32.totalorder %v4415_v41, %v257_v50 }
  0x8f   :  { %v3053_v47 = vsel %vm439_vm3, 1.0, %v3979_v44  ;;  %v3055_v18 = vsel %vm441_vm6, 1.0, %v3979_v44 }
  0x90   :  { %v630_v48 = vpack.c.bf16 %v3053_v47, %v3052_v45  ;;  %v631_v22 = vpack.c.bf16 %v3055_v18, %v3054_v17 }
  0x91   :  { %v263_v51 = vpop.permute.xlu1 %262  ;;  %v260_v52 = vpop.permute.xlu0 %259 }
  0x92   :  { %3580 = vmatprep.mubr.msk.bf16.mxu1 %vm171_vm4, %v630_v48  ;;  %vm443_vm7 = vcmp.eq.s32.totalorder %v4415_v41, %v263_v51  ;;  %vm442_vm8 = vcmp.eq.s32.totalorder %v4415_v41, %v260_v52 }
  0x93   :  { %v3057_v20 = vsel %vm443_vm7, 1.0, %v3979_v44  ;;  %v3056_v21 = vsel %vm442_vm8, 1.0, %v3979_v44 }
  0x94   :  { %v632_v23 = vpack.c.bf16 %v3057_v20, %v3056_v21 }
  0x95   :  { %v269_v53 = vpop.permute.xlu1 %268  ;;  %v266_v54 = vpop.permute.xlu0 %265 }
  0x96   :  { %vm445_vm9 = vcmp.eq.s32.totalorder %v4415_v41, %v269_v53  ;;  %vm444_vm10 = vcmp.eq.s32.totalorder %v4415_v41, %v266_v54 }
  0x97   :  { %v3059_v26 = vsel %vm445_vm9, 1.0, %v3979_v44  ;;  %v3058_v27 = vsel %vm444_vm10, 1.0, %v3979_v44 }
  0x98   :  { %v633_v30 = vpack.c.bf16 %v3059_v26, %v3058_v27 }
  0x99   :  { %v275_v55 = vpop.permute.xlu1 %274  ;;  %v272_v56 = vpop.permute.xlu0 %271 }
  0x9a   :  { %vm447_vm11 = vcmp.eq.s32.totalorder %v4415_v41, %v275_v55  ;;  %vm446_vm12 = vcmp.eq.s32.totalorder %v4415_v41, %v272_v56 }
  0x9b   :  { %v3061_v28 = vsel %vm447_vm11, 1.0, %v3979_v44  ;;  %v3060_v29 = vsel %vm446_vm12, 1.0, %v3979_v44 }
  0x9c   :  { %v634_v33 = vpack.c.bf16 %v3061_v28, %v3060_v29 }
  0x9d   :  { %v4428_v57 = vpop.permute.xlu1 %280  ;;  %v4430_v58 = vpop.permute.xlu0 %277 }
  0x9e   :  { %vm449_vm13 = vcmp.eq.s32.totalorder %v4415_v41, %v4428_v57  ;;  %vm448_vm14 = vcmp.eq.s32.totalorder %v4415_v41, %v4430_v58 }
  0x9f   :  { %v3063_v34 = vsel %vm449_vm13, 1.0, %v3979_v44  ;;  %v3062_v35 = vsel %vm448_vm14, 1.0, %v3979_v44 }
  0xa0   :  { %v635_v42 = vpack.c.bf16 %v3063_v34, %v3062_v35 }
  0xa1   :  { %v4432_v59 = vpop.permute.xlu1 %286  ;;  %v4434_v60 = vpop.permute.xlu0 %283 }
  0xa2   :  { %vm451_vm15 = vcmp.eq.s32.totalorder %v4415_v41, %v4432_v59  ;;  %vm450_vm1 = vcmp.eq.s32.totalorder %v4415_v41, %v4434_v60 }
  0xa3   :  { %v3065_v36 = vsel %vm451_vm15, 1.0, %v3979_v44  ;;  %v3064_v38 = vsel %vm450_vm1, 1.0, %v3979_v44 }
  0xa4   :  { %v636_v43 = vpack.c.bf16 %v3065_v36, %v3064_v38 }
  0xa5   :  { %v4436_v61 = vpop.permute.xlu1 %292  ;;  %v4438_v62 = vpop.permute.xlu0 %289 }
  0xa6   :  { %vm453_vm2 = vcmp.eq.s32.totalorder %v4415_v41, %v4436_v61  ;;  %vm452_vm3 = vcmp.eq.s32.totalorder %v4415_v41, %v4438_v62 }
  0xa7   :  { %v3067_v47 = vsel %vm453_vm2, 1.0, %v3979_v44  ;;  %v3066_v48 = vsel %vm452_vm3, 1.0, %v3979_v44 }
  0xa8   :  { %v637_v51 = vpack.c.bf16 %v3067_v47, %v3066_v48 }
  0xa9   :  { %v4440_v63 = vpop.permute.xlu1 %298  ;;  %v4442_v0 = vpop.permute.xlu0 %295 }
  0xaa   :  { %vm455_vm5 = vcmp.eq.s32.totalorder %v4415_v41, %v4440_v63  ;;  %vm454_vm6 = vcmp.eq.s32.totalorder %v4415_v41, %v4442_v0 }
  0xab   :  { %v3069_v49 = vsel %vm455_vm5, 1.0, %v3979_v44  ;;  %v3068_v50 = vsel %vm454_vm6, 1.0, %v3979_v44 }
  0xac   :  { %v638_v52 = vpack.c.bf16 %v3069_v49, %v3068_v50 }
  0xad   :  { %v4444_v1 = vpop.permute.xlu1 %304  ;;  %v4446_v2 = vpop.permute.xlu0 %301 }
  0xae   :  { %vm457_vm7 = vcmp.eq.s32.totalorder %v4415_v41, %v4444_v1  ;;  %vm456_vm8 = vcmp.eq.s32.totalorder %v4415_v41, %v4446_v2 }
  0xaf   :  { %v3071_v55 = vsel %vm457_vm7, 1.0, %v3979_v44  ;;  %v3070_v56 = vsel %vm456_vm8, 1.0, %v3979_v44 }
  0xb0   :  { %v639_v59 = vpack.c.bf16 %v3071_v55, %v3070_v56 }
  0xb1   :  { %v4448_v6 = vpop.permute.xlu1 %310  ;;  %v4450_v7 = vpop.permute.xlu0 %307 }
  0xb2   :  { %vm459_vm9 = vcmp.eq.s32.totalorder %v4415_v41, %v4448_v6  ;;  %vm458_vm10 = vcmp.eq.s32.totalorder %v4415_v41, %v4450_v7 }
  0xb3   :  { %v3073_v57 = vsel %vm459_vm9, 1.0, %v3979_v44  ;;  %v3072_v58 = vsel %vm458_vm10, 1.0, %v3979_v44 }
  0xb4   :  { %v640_v62 = vpack.c.bf16 %v3073_v57, %v3072_v58 }
  0xb5   :  { %v4453_v12 = vpop.permute.xlu1 %316  ;;  %v4455_v13 = vpop.permute.xlu0 %313 }
  0xb6   :  { %vm461_vm11 = vcmp.eq.s32.totalorder %v4415_v41, %v4453_v12  ;;  %vm460_vm12 = vcmp.eq.s32.totalorder %v4415_v41, %v4455_v13 }
  0xb7   :  { %v3075_v63 = vsel %vm461_vm11, 1.0, %v3979_v44  ;;  %v3074_v0 = vsel %vm460_vm12, 1.0, %v3979_v44 }
  0xb8   :  { %v641_v6 = vpack.c.bf16 %v3075_v63, %v3074_v0  ;;  %v3944_v63 = vld [vmem:[%s5087_s9] sm:$0xff]  }
  0xb9   :  { %v4462_v15 = vpop.permute.xlu1 %322  ;;  %v4464_v16 = vpop.permute.xlu0 %319  ;;  %3644 = vmatprep.subr.bf16.mxu0 %v3944_v63 }
  0xba   :  { %vm463_vm13 = vcmp.eq.s32.totalorder %v4415_v41, %v4462_v15  ;;  %vm462_vm14 = vcmp.eq.s32.totalorder %v4415_v41, %v4464_v16  ;;  %3645 = vmatpush3.bf16.msra.mxu0 %v3944_v63 }
  0xbb   :  { %v3077_v1 = vsel %vm463_vm13, 1.0, %v3979_v44  ;;  %v3076_v2 = vsel %vm462_vm14, 1.0, %v3979_v44 }
  0xbc   :  { %v642_v7 = vpack.c.bf16 %v3077_v1, %v3076_v2 }
  0xbd   :  { %v4472_v24 = vpop.permute.xlu1 %328  ;;  %v4474_v25 = vpop.permute.xlu0 %325 }
  0xbe   :  { %vm465_vm15 = vcmp.eq.s32.totalorder %v4415_v41, %v4472_v24  ;;  %vm464_vm1 = vcmp.eq.s32.totalorder %v4415_v41, %v4474_v25 }
  0xc1   :  { %v4484_v31 = vpop.permute.xlu1 %334  ;;  %v4486_v32 = vpop.permute.xlu0 %331 }
  0xc2   :  { %vm467_vm2 = vcmp.eq.s32.totalorder %v4415_v41, %v4484_v31  ;;  %vm466_vm3 = vcmp.eq.s32.totalorder %v4415_v41, %v4486_v32 }
  0xc3   :  { %v3081_v12 = vsel %vm467_vm2, 1.0, %v3979_v44  ;;  %v3080_v13 = vsel %vm466_vm3, 1.0, %v3979_v44 }
  0xc4   :  { %v644_v15 = vpack.c.bf16 %v3081_v12, %v3080_v13 }
  0xc5   :  { %v4502_v39 = vpop.permute.xlu1 %340  ;;  %v4504_v40 = vpop.permute.xlu0 %337 }
  0xc6   :  { %vm469_vm5 = vcmp.eq.s32.totalorder %v4415_v41, %v4502_v39  ;;  %vm468_vm6 = vcmp.eq.s32.totalorder %v4415_v41, %v4504_v40 }
  0xc7   :  { %v3083_v18 = vsel %vm469_vm5, 1.0, %v3979_v44 }
  0xc9   :  { %v4516_v45 = vpop.permute.xlu1 %346  ;;  %v4518_v46 = vpop.permute.xlu0 %343 }
  0xca   :  { %vm471_vm7 = vcmp.eq.s32.totalorder %v4415_v41, %v4516_v45  ;;  %vm470_vm8 = vcmp.eq.s32.totalorder %v4415_v41, %v4518_v46 }
  0xcb   :  { %v3085_v20 = vsel %vm471_vm7, 1.0, %v3979_v44  ;;  %v3084_v21 = vsel %vm470_vm8, 1.0, %v3979_v44 }
  0xcc   :  { %v646_v25 = vpack.c.bf16 %v3085_v20, %v3084_v21 }
  0xcd   :  { %v4528_v53 = vpop.permute.xlu1 %352  ;;  %v4530_v54 = vpop.permute.xlu0 %349 }
  0xce   :  { %vm473_vm9 = vcmp.eq.s32.totalorder %v4415_v41, %v4528_v53  ;;  %vm472_vm10 = vcmp.eq.s32.totalorder %v4415_v41, %v4530_v54 }
  0xcf   :  { %v3087_v26 = vsel %vm473_vm9, 1.0, %v3979_v44  ;;  %v3086_v27 = vsel %vm472_vm10, 1.0, %v3979_v44 }
  0xd0   :  { %v647_v32 = vpack.c.bf16 %v3087_v26, %v3086_v27 }
  0xd1   :  { %v359_v60 = vpop.permute.xlu1 %358  ;;  %v356_v61 = vpop.permute.xlu0 %355 }
  0xd2   :  { %vm475_vm11 = vcmp.eq.s32.totalorder %v4415_v41, %v359_v60  ;;  %vm474_vm12 = vcmp.eq.s32.totalorder %v4415_v41, %v356_v61 }
  0xd3   :  { %v3089_v28 = vsel %vm475_vm11, 1.0, %v3979_v44  ;;  %v3088_v29 = vsel %vm474_vm12, 1.0, %v3979_v44 }
  0xd9   :  { %v3506_v3 = vpop.f32.mrb[0].mxu0 }
  0xda   :  { %v150_v4 = vpop.f32.mrb[1].mxu0 }
  0xdb   :  { %v169_v8 = vpack.c.bf16 %v3506_v3, %v150_v4  ;;  %v365_v3 = vpop.permute.xlu1 %364  ;;  %v362_v4 = vpop.permute.xlu0 %361 }
  0xdc   :  { %vm477_vm13 = vcmp.eq.s32.totalorder %v4415_v41, %v365_v3  ;;  %vm476_vm14 = vcmp.eq.s32.totalorder %v4415_v41, %v362_v4  ;;  %v3945_v4 = vld [vmem:[%s5087_s9 + $0x8] sm:$0xff]   ;;  %s3954_s9 = scalar_lea.vmem %s3038_s23, 512 }
  0xdd   :  { %172 = vst.msk [vmem:[#allocation3] sm:$0xff] %vm171_vm4, %v169_v8  ;;  %v3091_v36 = vsel %vm477_vm13, 1.0, %v3979_v44  ;;  %v3090_v38 = vsel %vm476_vm14, 1.0, %v3979_v44  ;;  %3646 = vmatprep.subr.bf16.mxu0 %v3945_v4  ;;  %p3955_p0 = scmp.ne.s32.totalorder %s3038_s23, %s3954_s9  ;;  %p3960_p2 = scmp.lt.s32.totalorder %s3954_s9, %s3954_s9 }
  0xde   :  { %v3509_v9 = vpop.f32.mrb[2].mxu0  ;;  %3647 = vmatpush3.bf16.msra.mxu0 %v3945_v4 }
  0xdf   :  { %v160_v10 = vpop.f32.mrb[3].mxu0  ;;  %v371_v8 = vpop.permute.xlu1 %370  ;;  %p3961_p3 = por %p3960_p2, %p3959_p1 }
  0xe0   :  { %v170_v11 = vpack.c.bf16 %v3509_v9, %v160_v10  ;;  %v368_v9 = vpop.permute.xlu0 %367  ;;  %v3079_v10 = vsel %vm465_vm15, 1.0, %v3979_v44  ;;  %vm479_vm15 = vcmp.eq.s32.totalorder %v4415_v41, %v371_v8 }
  0xe1   :  { %v3093_v39 = vsel %vm479_vm15, 1.0, %v3979_v44  ;;  %p3962_p4 = pnand %p3961_p3, %p3955_p0 }
  0xe2   :  { %173 = vst.msk [vmem:[#allocation3 + $0x8] sm:$0xff] %vm171_vm4, %v170_v11  ;;  %v3078_v11 = vsel %vm464_vm1, 1.0, %v3979_v44  ;;  %vm478_vm1 = vcmp.eq.s32.totalorder %v4415_v41, %v368_v9 }
  0xe3   :  { %v377_v16 = vpop.permute.xlu1 %376  ;;  %v3092_v40 = vsel %vm478_vm1, 1.0, %v3979_v44 }
  0xe4   :  { %v734_v14 = vld [vmem:[#allocation3] sm:$0xff]  ;;  %v374_v17 = vpop.permute.xlu0 %373  ;;  %vm481_vm2 = vcmp.eq.s32.totalorder %v4415_v41, %v377_v16 }
  0xe5   :  { %3576 = vmatprep.subr.bf16.mxu1 %v734_v14  ;;  %vm480_vm3 = vcmp.eq.s32.totalorder %v4415_v41, %v374_v17  ;;  %v3095_v47 = vsel %vm481_vm2, 1.0, %v3979_v44 }
  0xe6   :  { %3577 = vmatpush3.bf16.msra.mxu1 %v734_v14  ;;  %v643_v14 = vpack.c.bf16 %v3079_v10, %v3078_v11  ;;  %v3094_v48 = vsel %vm480_vm3, 1.0, %v3979_v44 }
  0xe8   :  { %v380_v24 = vpop.permute.xlu0 %379 }
  0xe9   :  { %v735_v19 = vld [vmem:[#allocation3 + $0x8] sm:$0xff] }
  0xea   :  { %3578 = vmatprep.subr.bf16.mxu1 %v735_v19 }
  0xeb   :  { %3579 = vmatpush3.bf16.msra.mxu1 %v735_v19  ;;  %v3082_v19 = vsel %vm468_vm6, 1.0, %v3979_v44  ;;  %vm482_vm6 = vcmp.eq.s32.totalorder %v4415_v41, %v380_v24 }
  0xec   :  { %v386_v31 = vpop.permute.xlu0 %385  ;;  %v3096_v50 = vsel %vm482_vm6, 1.0, %v3979_v44 }
  0xed   :  { %vm484_vm8 = vcmp.eq.s32.totalorder %v4415_v41, %v386_v31  ;;  %v4672_v31 = vld [vmem:[%s5086_s8] ss:$0 sm:$0xff] }
  0xee   :  { %3581 = vmatmul.mubr.msk.bf16.vlgmr.msra.gmra.mrb[0].mxu1 %vm171_vm4, %v631_v22  ;;  %v645_v22 = vpack.c.bf16 %v3083_v18, %v3082_v19  ;;  %v3098_v56 = vsel %vm484_vm8, 1.0, %v3979_v44 }
  0xef   :  { %3584 = vmatprep.mubr.msk.bf16.mxu1 %vm171_vm4, %v632_v23  ;;  %v383_v23 = vpop.permute.xlu1 %382 }
  0xf0   :  { %v392_v35 = vpop.permute.xlu0 %391  ;;  %vm483_vm5 = vcmp.eq.s32.totalorder %v4415_v41, %v383_v23 }
  0xf1   :  { %v3097_v49 = vsel %vm483_vm5, 1.0, %v3979_v44  ;;  %vm486_vm10 = vcmp.eq.s32.totalorder %v4415_v41, %v392_v35 }
  0xf2   :  { %v652_v54 = vpack.c.bf16 %v3097_v49, %v3096_v50  ;;  %v3100_v58 = vsel %vm486_vm10, 1.0, %v3979_v44 }
  0xf4   :  { %v398_v46 = vpop.permute.xlu0 %397 }
  0xf5   :  { %vm488_vm12 = vcmp.eq.s32.totalorder %v4415_v41, %v398_v46 }
  0xf6   :  { %3585 = vmatmul.mubr.msk.bf16.gmra.mrb[4].mxu1 %vm171_vm4, %v633_v30  ;;  %v389_v30 = vpop.permute.xlu1 %388  ;;  %v3102_v3 = vsel %vm488_vm12, 1.0, %v3979_v44 }
  0xf7   :  { %3588 = vmatprep.mubr.msk.bf16.mxu1 %vm171_vm4, %v634_v33  ;;  %v648_v33 = vpack.c.bf16 %v3089_v28, %v3088_v29  ;;  %vm485_vm7 = vcmp.eq.s32.totalorder %v4415_v41, %v389_v30 }
  0xf8   :  { %v404_v53 = vpop.permute.xlu0 %403  ;;  %v3099_v55 = vsel %vm485_vm7, 1.0, %v3979_v44 }
  0xf9   :  { %v653_v61 = vpack.c.bf16 %v3099_v55, %v3098_v56  ;;  %vm490_vm14 = vcmp.eq.s32.totalorder %v4415_v41, %v404_v53 }
  0xfa   :  { %v395_v34 = vpop.permute.xlu1 %394 }
  0xfb   :  { %vm487_vm9 = vcmp.eq.s32.totalorder %v4415_v41, %v395_v34 }
  0xfc   :  { %v3101_v57 = vsel %vm487_vm9, 1.0, %v3979_v44  ;;  %v410_v60 = vpop.permute.xlu0 %409 }
  0xfd   :  { %vm492_vm1 = vcmp.eq.s32.totalorder %v4415_v41, %v410_v60 }
  0xfe   :  { %3589 = vmatmul.mubr.msk.bf16.gmra.mrb[8].mxu1 %vm171_vm4, %v635_v42  ;;  %v649_v42 = vpack.c.bf16 %v3091_v36, %v3090_v38  ;;  %v401_v45 = vpop.permute.xlu1 %400  ;;  %v3106_v13 = vsel %vm492_vm1, 1.0, %v3979_v44 }
  0xff   :  { %3592 = vmatprep.mubr.msk.bf16.mxu1 %vm171_vm4, %v636_v43  ;;  %v650_v43 = vpack.c.bf16 %v3093_v39, %v3092_v40  ;;  %vm489_vm11 = vcmp.eq.s32.totalorder %v4415_v41, %v401_v45 }
 0x100   :  { %v416_v1 = vpop.permute.xlu0 %415  ;;  %v3103_v2 = vsel %vm489_vm11, 1.0, %v3979_v44 }
 0x101   :  { %v655_v8 = vpack.c.bf16 %v3103_v2, %v3102_v3  ;;  %vm494_vm3 = vcmp.eq.s32.totalorder %v4415_v41, %v416_v1 }
 0x104   :  { %v422_v11 = vpop.permute.xlu0 %421 }
 0x105   :  { %vm496_vm6 = vcmp.eq.s32.totalorder %v4415_v41, %v422_v11 }
 0x106   :  { %3593 = vmatmul.mubr.msk.bf16.gmra.mrb[12].mxu1 %vm171_vm4, %v637_v51  ;;  %v651_v51 = vpack.c.bf16 %v3095_v47, %v3094_v48  ;;  %v3110_v21 = vsel %vm496_vm6, 1.0, %v3979_v44 }
 0x107   :  { %3596 = vmatprep.mubr.msk.bf16.mxu1 %vm171_vm4, %v638_v52  ;;  %v407_v52 = vpop.permute.xlu1 %406 }
 0x108   :  { %vm491_vm13 = vcmp.eq.s32.totalorder %v4415_v41, %v407_v52  ;;  %v428_v18 = vpop.permute.xlu0 %427 }
 0x109   :  { %vm498_vm8 = vcmp.eq.s32.totalorder %v4415_v41, %v428_v18 }
 0x10a   :  { %v3112_v23 = vsel %vm498_vm8, 1.0, %v3979_v44 }
 0x10e   :  { %3597 = vmatmul.mubr.msk.bf16.gmra.mrb[16].mxu1 %vm171_vm4, %v639_v59  ;;  %v413_v59 = vpop.permute.xlu1 %412 }
 0x10f   :  { %3600 = vmatprep.mubr.msk.bf16.mxu1 %vm171_vm4, %v640_v62  ;;  %v654_v62 = vpack.c.bf16 %v3101_v57, %v3100_v58  ;;  %vm493_vm15 = vcmp.eq.s32.totalorder %v4415_v41, %v413_v59 }
 0x110   :  { %v3107_v12 = vsel %vm493_vm15, 1.0, %v3979_v44 }
 0x111   :  { %v657_v16 = vpack.c.bf16 %v3107_v12, %v3106_v13 }
 0x112   :  { %v419_v0 = vpop.permute.xlu1 %418 }
 0x113   :  { %vm495_vm2 = vcmp.eq.s32.totalorder %v4415_v41, %v419_v0 }
 0x116   :  { %3601 = vmatmul.mubr.msk.bf16.gmra.mrb[20].mxu1 %vm171_vm4, %v641_v6  ;;  %v3105_v6 = vsel %vm491_vm13, 1.0, %v3979_v44  ;;  %v425_v10 = vpop.permute.xlu1 %424 }
 0x117   :  { %3604 = vmatprep.mubr.msk.bf16.mxu1 %vm171_vm4, %v642_v7  ;;  %v3104_v7 = vsel %vm490_vm14, 1.0, %v3979_v44  ;;  %vm497_vm5 = vcmp.eq.s32.totalorder %v4415_v41, %v425_v10 }
 0x118   :  { %v656_v9 = vpack.c.bf16 %v3105_v6, %v3104_v7  ;;  %v3111_v20 = vsel %vm497_vm5, 1.0, %v3979_v44 }
 0x119   :  { %v659_v26 = vpack.c.bf16 %v3111_v20, %v3110_v21 }
 0x11a   :  { %v431_v17 = vpop.permute.xlu1 %430 }
 0x11b   :  { %vm499_vm7 = vcmp.eq.s32.totalorder %v4415_v41, %v431_v17 }
 0x11e   :  { %3605 = vmatmul.mubr.msk.bf16.gmra.mrb[24].mxu1 %vm171_vm4, %v643_v14  ;;  %v3109_v14 = vsel %vm495_vm2, 1.0, %v3979_v44  ;;  %v437_v24 = vpop.permute.xlu1 %436 }
 0x11f   :  { %3608 = vmatprep.mubr.msk.bf16.mxu1 %vm171_vm4, %v644_v15  ;;  %v3108_v15 = vsel %vm494_vm3, 1.0, %v3979_v44  ;;  %vm501_vm9 = vcmp.eq.s32.totalorder %v4415_v41, %v437_v24 }
 0x120   :  { %v658_v19 = vpack.c.bf16 %v3109_v14, %v3108_v15  ;;  %v3115_v28 = vsel %vm501_vm9, 1.0, %v3979_v44 }
 0x126   :  { %3609 = vmatmul.mubr.msk.bf16.gmra.mrb[28].mxu1 %vm171_vm4, %v645_v22  ;;  %v3113_v22 = vsel %vm499_vm7, 1.0, %v3979_v44 }
 0x127   :  { %3612 = vmatprep.mubr.msk.bf16.mxu1 %vm171_vm4, %v646_v25  ;;  %v434_v25 = vpop.permute.xlu0 %433  ;;  %v660_v27 = vpack.c.bf16 %v3113_v22, %v3112_v23 }
 0x128   :  { %vm500_vm10 = vcmp.eq.s32.totalorder %v4415_v41, %v434_v25 }
 0x129   :  { %v3114_v29 = vsel %vm500_vm10, 1.0, %v3979_v44 }
 0x12a   :  { %v661_v30 = vpack.c.bf16 %v3115_v28, %v3114_v29 }
 0x12e   :  { %3613 = vmatmul.mubr.msk.bf16.gmra.mrb[32].mxu1 %vm171_vm4, %v647_v32 }
 0x12f   :  { %3616 = vmatprep.mubr.msk.bf16.mxu1 %vm171_vm4, %v648_v33 }
 0x136   :  { %3617 = vmatmul.mubr.msk.bf16.gmra.mrb[36].mxu1 %vm171_vm4, %v649_v42 }
 0x137   :  { %3620 = vmatprep.mubr.msk.bf16.mxu1 %vm171_vm4, %v650_v43 }
 0x13e   :  { %3621 = vmatmul.mubr.msk.bf16.gmra.mrb[40].mxu1 %vm171_vm4, %v651_v51 }
 0x13f   :  { %3624 = vmatprep.mubr.msk.bf16.mxu1 %vm171_vm4, %v652_v54 }
 0x146   :  { %3625 = vmatmul.mubr.msk.bf16.gmra.mrb[44].mxu1 %vm171_vm4, %v653_v61 }
 0x147   :  { %3628 = vmatprep.mubr.msk.bf16.mxu1 %vm171_vm4, %v654_v62 }
 0x14e   :  { %3629 = vmatmul.mubr.msk.bf16.gmra.mrb[48].mxu1 %vm171_vm4, %v655_v8 }
 0x14f   :  { %3632 = vmatprep.mubr.msk.bf16.mxu1 %vm171_vm4, %v656_v9 }
 0x156   :  { %3633 = vmatmul.mubr.msk.bf16.gmra.mrb[52].mxu1 %vm171_vm4, %v657_v16 }
 0x157   :  { %3636 = vmatprep.mubr.msk.bf16.mxu1 %vm171_vm4, %v658_v19 }
 0x15e   :  { %3637 = vmatmul.mubr.msk.bf16.gmra.mrb[56].mxu1 %vm171_vm4, %v659_v26 }
 0x15f   :  { %3640 = vmatprep.mubr.msk.bf16.mxu1 %vm171_vm4, %v660_v27 }
 0x166   :  { %3641 = vmatmul.mubr.msk.bf16.gmra.mrb[60].mxu1 %vm171_vm4, %v661_v30 }
 0x1c1   :  { %v3582_v32 = vpop.f32.mrb[0].mxu1 }
 0x1c2   :  { %v1746_v33 = vadd.f32 %v3582_v32, %v4672_v31  ;;  %v1482_v34 = vpop.f32.mrb[1].mxu1 }
 0x1c3   :  { %v1744_v35 = vadd.f32 %v4672_v31, %v1482_v34  ;;  %v3583_v36 = vpop.f32.mrb[2].mxu1 }
 0x1c4   :  { %v1747_v38 = vadd.f32 %v3583_v36, %v4672_v31  ;;  %v1485_v39 = vpop.f32.mrb[3].mxu1  ;;  %v1810_v42 = vmax.f32 %v1746_v33, 0.0 }
 0x1c5   :  { %v1745_v40 = vadd.f32 %v4672_v31, %v1485_v39  ;;  %v1808_v45 = vmax.f32 %v1744_v35, 0.0 }
 0x1c6   :  { %v1811_v43 = vmax.f32 %v1747_v38, 0.0 }
 0x1c7   :  { %v1809_v46 = vmax.f32 %v1745_v40, 0.0 }
 0x1c8   :  { %v1873_v47 = vpack.c.bf16 %v1811_v43, %v1810_v42 }
 0x1c9   :  { %v1872_v48 = vpack.c.bf16 %v1809_v46, %v1808_v45  ;;  %v3586_v49 = vpop.f32.mrb[4].mxu1 }
 0x1ca   :  { %v1750_v50 = vadd.f32 %v3586_v49, %v4672_v31  ;;  %v1498_v51 = vpop.f32.mrb[5].mxu1 }
 0x1cb   :  { %v1748_v52 = vadd.f32 %v4672_v31, %v1498_v51  ;;  %v3587_v53 = vpop.f32.mrb[6].mxu1  ;;  %3648 = vmatprep.mubr.msk.bf16.mxu0 %vm171_vm4, %v1872_v48 }
 0x1cc   :  { %v1751_v54 = vadd.f32 %v3587_v53, %v4672_v31  ;;  %v1501_v55 = vpop.f32.mrb[7].mxu1  ;;  %3649 = vmatmul.mubr.msk.bf16.vlgmr.msra.gmra.mrb[4].mxu0 %vm171_vm4, %v1873_v47  ;;  %v1814_v57 = vmax.f32 %v1750_v50, 0.0 }
 0x1cd   :  { %v1749_v56 = vadd.f32 %v4672_v31, %v1501_v55  ;;  %v1812_v59 = vmax.f32 %v1748_v52, 0.0 }
 0x1ce   :  { %v1815_v58 = vmax.f32 %v1751_v54, 0.0 }
 0x1cf   :  { %v1813_v60 = vmax.f32 %v1749_v56, 0.0 }
 0x1d0   :  { %v1875_v61 = vpack.c.bf16 %v1815_v58, %v1814_v57 }
 0x1d1   :  { %v1874_v62 = vpack.c.bf16 %v1813_v60, %v1812_v59  ;;  %v3590_v63 = vpop.f32.mrb[8].mxu1 }
 0x1d2   :  { %v1754_v0 = vadd.f32 %v3590_v63, %v4672_v31  ;;  %v1514_v1 = vpop.f32.mrb[9].mxu1 }
 0x1d3   :  { %v1752_v2 = vadd.f32 %v4672_v31, %v1514_v1  ;;  %v3591_v3 = vpop.f32.mrb[10].mxu1  ;;  %3652 = vmatprep.mubr.msk.bf16.mxu0 %vm171_vm4, %v1874_v62 }
 0x1d4   :  { %v1755_v4 = vadd.f32 %v3591_v3, %v4672_v31  ;;  %v1517_v6 = vpop.f32.mrb[11].mxu1  ;;  %3653 = vmatmul.mubr.msk.bf16.gmra.mrb[8].mxu0 %vm171_vm4, %v1875_v61  ;;  %v1818_v8 = vmax.f32 %v1754_v0, 0.0 }
 0x1d5   :  { %v1753_v7 = vadd.f32 %v4672_v31, %v1517_v6  ;;  %v1816_v10 = vmax.f32 %v1752_v2, 0.0 }
 0x1d6   :  { %v1819_v9 = vmax.f32 %v1755_v4, 0.0 }
 0x1d7   :  { %v1817_v11 = vmax.f32 %v1753_v7, 0.0 }
 0x1d8   :  { %v1877_v12 = vpack.c.bf16 %v1819_v9, %v1818_v8 }
 0x1d9   :  { %v1876_v13 = vpack.c.bf16 %v1817_v11, %v1816_v10  ;;  %v3594_v14 = vpop.f32.mrb[12].mxu1 }
 0x1da   :  { %v1758_v15 = vadd.f32 %v3594_v14, %v4672_v31  ;;  %v1530_v16 = vpop.f32.mrb[13].mxu1 }
 0x1db   :  { %v1756_v17 = vadd.f32 %v4672_v31, %v1530_v16  ;;  %v3595_v18 = vpop.f32.mrb[14].mxu1  ;;  %3656 = vmatprep.mubr.msk.bf16.mxu0 %vm171_vm4, %v1876_v13 }
 0x1dc   :  { %v1759_v19 = vadd.f32 %v3595_v18, %v4672_v31  ;;  %v1533_v20 = vpop.f32.mrb[15].mxu1  ;;  %3657 = vmatmul.mubr.msk.bf16.gmra.mrb[12].mxu0 %vm171_vm4, %v1877_v12  ;;  %v1822_v22 = vmax.f32 %v1758_v15, 0.0 }
 0x1dd   :  { %v1757_v21 = vadd.f32 %v4672_v31, %v1533_v20  ;;  %v1820_v24 = vmax.f32 %v1756_v17, 0.0 }
 0x1de   :  { %v1823_v23 = vmax.f32 %v1759_v19, 0.0 }
 0x1df   :  { %v1821_v25 = vmax.f32 %v1757_v21, 0.0 }
 0x1e0   :  { %v1879_v26 = vpack.c.bf16 %v1823_v23, %v1822_v22 }
 0x1e1   :  { %v1878_v27 = vpack.c.bf16 %v1821_v25, %v1820_v24  ;;  %v3598_v28 = vpop.f32.mrb[16].mxu1 }
 0x1e2   :  { %v1762_v29 = vadd.f32 %v3598_v28, %v4672_v31  ;;  %v1546_v30 = vpop.f32.mrb[17].mxu1 }
 0x1e3   :  { %v1760_v32 = vadd.f32 %v4672_v31, %v1546_v30  ;;  %v3599_v33 = vpop.f32.mrb[18].mxu1  ;;  %3660 = vmatprep.mubr.msk.bf16.mxu0 %vm171_vm4, %v1878_v27 }
 0x1e4   :  { %v1763_v34 = vadd.f32 %v3599_v33, %v4672_v31  ;;  %v1549_v35 = vpop.f32.mrb[19].mxu1  ;;  %3661 = vmatmul.mubr.msk.bf16.gmra.mrb[16].mxu0 %vm171_vm4, %v1879_v26  ;;  %v1826_v38 = vmax.f32 %v1762_v29, 0.0 }
 0x1e5   :  { %v1761_v36 = vadd.f32 %v4672_v31, %v1549_v35  ;;  %v1824_v40 = vmax.f32 %v1760_v32, 0.0 }
 0x1e6   :  { %v1827_v39 = vmax.f32 %v1763_v34, 0.0 }
 0x1e7   :  { %v1825_v42 = vmax.f32 %v1761_v36, 0.0 }
 0x1e8   :  { %v1881_v43 = vpack.c.bf16 %v1827_v39, %v1826_v38 }
 0x1e9   :  { %v1880_v45 = vpack.c.bf16 %v1825_v42, %v1824_v40  ;;  %v3602_v46 = vpop.f32.mrb[20].mxu1 }
 0x1ea   :  { %v1766_v47 = vadd.f32 %v3602_v46, %v4672_v31  ;;  %v1562_v48 = vpop.f32.mrb[21].mxu1 }
 0x1eb   :  { %v1764_v49 = vadd.f32 %v4672_v31, %v1562_v48  ;;  %v3603_v50 = vpop.f32.mrb[22].mxu1  ;;  %3664 = vmatprep.mubr.msk.bf16.mxu0 %vm171_vm4, %v1880_v45 }
 0x1ec   :  { %v1767_v51 = vadd.f32 %v3603_v50, %v4672_v31  ;;  %v1565_v52 = vpop.f32.mrb[23].mxu1  ;;  %3665 = vmatmul.mubr.msk.bf16.gmra.mrb[20].mxu0 %vm171_vm4, %v1881_v43  ;;  %v1830_v54 = vmax.f32 %v1766_v47, 0.0 }
 0x1ed   :  { %v1765_v53 = vadd.f32 %v4672_v31, %v1565_v52  ;;  %v1828_v56 = vmax.f32 %v1764_v49, 0.0 }
 0x1ee   :  { %v1831_v55 = vmax.f32 %v1767_v51, 0.0 }
 0x1ef   :  { %v1829_v57 = vmax.f32 %v1765_v53, 0.0 }
 0x1f0   :  { %v1883_v58 = vpack.c.bf16 %v1831_v55, %v1830_v54 }
 0x1f1   :  { %v1882_v59 = vpack.c.bf16 %v1829_v57, %v1828_v56  ;;  %v3606_v60 = vpop.f32.mrb[24].mxu1 }
 0x1f2   :  { %v1770_v61 = vadd.f32 %v3606_v60, %v4672_v31  ;;  %v1578_v62 = vpop.f32.mrb[25].mxu1 }
 0x1f3   :  { %v1768_v63 = vadd.f32 %v4672_v31, %v1578_v62  ;;  %v3607_v0 = vpop.f32.mrb[26].mxu1  ;;  %3668 = vmatprep.mubr.msk.bf16.mxu0 %vm171_vm4, %v1882_v59 }
 0x1f4   :  { %v1771_v1 = vadd.f32 %v3607_v0, %v4672_v31  ;;  %v1581_v2 = vpop.f32.mrb[27].mxu1  ;;  %3669 = vmatmul.mubr.msk.bf16.gmra.mrb[24].mxu0 %vm171_vm4, %v1883_v58  ;;  %v1834_v4 = vmax.f32 %v1770_v61, 0.0 }
 0x1f5   :  { %v1769_v3 = vadd.f32 %v4672_v31, %v1581_v2  ;;  %v1832_v7 = vmax.f32 %v1768_v63, 0.0 }
 0x1f6   :  { %v1835_v6 = vmax.f32 %v1771_v1, 0.0 }
 0x1f7   :  { %v1833_v8 = vmax.f32 %v1769_v3, 0.0 }
 0x1f8   :  { %v1885_v9 = vpack.c.bf16 %v1835_v6, %v1834_v4 }
 0x1f9   :  { %v1884_v10 = vpack.c.bf16 %v1833_v8, %v1832_v7  ;;  %v3610_v11 = vpop.f32.mrb[28].mxu1 }
 0x1fa   :  { %v1774_v12 = vadd.f32 %v3610_v11, %v4672_v31  ;;  %v1594_v13 = vpop.f32.mrb[29].mxu1 }
 0x1fb   :  { %v1772_v14 = vadd.f32 %v4672_v31, %v1594_v13  ;;  %v3611_v15 = vpop.f32.mrb[30].mxu1  ;;  %3672 = vmatprep.mubr.msk.bf16.mxu0 %vm171_vm4, %v1884_v10 }
 0x1fc   :  { %v1775_v16 = vadd.f32 %v3611_v15, %v4672_v31  ;;  %v1597_v17 = vpop.f32.mrb[31].mxu1  ;;  %3673 = vmatmul.mubr.msk.bf16.gmra.mrb[28].mxu0 %vm171_vm4, %v1885_v9  ;;  %v1838_v19 = vmax.f32 %v1774_v12, 0.0 }
 0x1fd   :  { %v1773_v18 = vadd.f32 %v4672_v31, %v1597_v17  ;;  %v1836_v21 = vmax.f32 %v1772_v14, 0.0 }
 0x1fe   :  { %v1839_v20 = vmax.f32 %v1775_v16, 0.0 }
 0x1ff   :  { %v1837_v22 = vmax.f32 %v1773_v18, 0.0 }
 0x200   :  { %v1887_v23 = vpack.c.bf16 %v1839_v20, %v1838_v19 }
 0x201   :  { %v1886_v24 = vpack.c.bf16 %v1837_v22, %v1836_v21  ;;  %v3614_v25 = vpop.f32.mrb[32].mxu1 }
 0x202   :  { %v1778_v26 = vadd.f32 %v3614_v25, %v4672_v31  ;;  %v1610_v27 = vpop.f32.mrb[33].mxu1 }
 0x203   :  { %v1776_v28 = vadd.f32 %v4672_v31, %v1610_v27  ;;  %v3615_v29 = vpop.f32.mrb[34].mxu1  ;;  %3676 = vmatprep.mubr.msk.bf16.mxu0 %vm171_vm4, %v1886_v24 }
 0x204   :  { %v1779_v30 = vadd.f32 %v3615_v29, %v4672_v31  ;;  %v1613_v32 = vpop.f32.mrb[35].mxu1  ;;  %3677 = vmatmul.mubr.msk.bf16.gmra.mrb[32].mxu0 %vm171_vm4, %v1887_v23  ;;  %v1842_v34 = vmax.f32 %v1778_v26, 0.0 }
 0x205   :  { %v1777_v33 = vadd.f32 %v4672_v31, %v1613_v32  ;;  %v1840_v36 = vmax.f32 %v1776_v28, 0.0 }
 0x206   :  { %v1843_v35 = vmax.f32 %v1779_v30, 0.0 }
 0x207   :  { %v1841_v38 = vmax.f32 %v1777_v33, 0.0 }
 0x208   :  { %v1889_v39 = vpack.c.bf16 %v1843_v35, %v1842_v34 }
 0x209   :  { %v1888_v40 = vpack.c.bf16 %v1841_v38, %v1840_v36  ;;  %v3618_v42 = vpop.f32.mrb[36].mxu1 }
 0x20a   :  { %v1782_v43 = vadd.f32 %v3618_v42, %v4672_v31  ;;  %v1626_v45 = vpop.f32.mrb[37].mxu1 }
 0x20b   :  { %v1780_v46 = vadd.f32 %v4672_v31, %v1626_v45  ;;  %v3619_v47 = vpop.f32.mrb[38].mxu1  ;;  %3680 = vmatprep.mubr.msk.bf16.mxu0 %vm171_vm4, %v1888_v40 }
 0x20c   :  { %v1783_v48 = vadd.f32 %v3619_v47, %v4672_v31  ;;  %v1629_v49 = vpop.f32.mrb[39].mxu1  ;;  %3681 = vmatmul.mubr.msk.bf16.gmra.mrb[36].mxu0 %vm171_vm4, %v1889_v39  ;;  %v1846_v51 = vmax.f32 %v1782_v43, 0.0 }
 0x20d   :  { %v1781_v50 = vadd.f32 %v4672_v31, %v1629_v49  ;;  %v1844_v53 = vmax.f32 %v1780_v46, 0.0 }
 0x20e   :  { %v1847_v52 = vmax.f32 %v1783_v48, 0.0 }
 0x20f   :  { %v1845_v54 = vmax.f32 %v1781_v50, 0.0 }
 0x210   :  { %v1891_v55 = vpack.c.bf16 %v1847_v52, %v1846_v51 }
 0x211   :  { %v1890_v56 = vpack.c.bf16 %v1845_v54, %v1844_v53  ;;  %v3622_v57 = vpop.f32.mrb[40].mxu1 }
 0x212   :  { %v1786_v58 = vadd.f32 %v3622_v57, %v4672_v31  ;;  %v1642_v59 = vpop.f32.mrb[41].mxu1 }
 0x213   :  { %v1784_v60 = vadd.f32 %v4672_v31, %v1642_v59  ;;  %v3623_v61 = vpop.f32.mrb[42].mxu1  ;;  %3684 = vmatprep.mubr.msk.bf16.mxu0 %vm171_vm4, %v1890_v56 }
 0x214   :  { %v1787_v62 = vadd.f32 %v3623_v61, %v4672_v31  ;;  %v1645_v63 = vpop.f32.mrb[43].mxu1  ;;  %3685 = vmatmul.mubr.msk.bf16.gmra.mrb[40].mxu0 %vm171_vm4, %v1891_v55  ;;  %v1850_v1 = vmax.f32 %v1786_v58, 0.0 }
 0x215   :  { %v1785_v0 = vadd.f32 %v4672_v31, %v1645_v63  ;;  %v1848_v3 = vmax.f32 %v1784_v60, 0.0 }
 0x216   :  { %v1851_v2 = vmax.f32 %v1787_v62, 0.0 }
 0x217   :  { %v1849_v4 = vmax.f32 %v1785_v0, 0.0 }
 0x218   :  { %v1893_v6 = vpack.c.bf16 %v1851_v2, %v1850_v1 }
 0x219   :  { %v1892_v7 = vpack.c.bf16 %v1849_v4, %v1848_v3  ;;  %v3626_v8 = vpop.f32.mrb[44].mxu1 }
 0x21a   :  { %v1790_v9 = vadd.f32 %v3626_v8, %v4672_v31  ;;  %v1658_v10 = vpop.f32.mrb[45].mxu1 }
 0x21b   :  { %v1788_v11 = vadd.f32 %v4672_v31, %v1658_v10  ;;  %v3627_v12 = vpop.f32.mrb[46].mxu1  ;;  %3688 = vmatprep.mubr.msk.bf16.mxu0 %vm171_vm4, %v1892_v7 }
 0x21c   :  { %v1791_v13 = vadd.f32 %v3627_v12, %v4672_v31  ;;  %v1661_v14 = vpop.f32.mrb[47].mxu1  ;;  %3689 = vmatmul.mubr.msk.bf16.gmra.mrb[44].mxu0 %vm171_vm4, %v1893_v6  ;;  %v1854_v16 = vmax.f32 %v1790_v9, 0.0 }
 0x21d   :  { %v1789_v15 = vadd.f32 %v4672_v31, %v1661_v14  ;;  %v1852_v18 = vmax.f32 %v1788_v11, 0.0 }
 0x21e   :  { %v1855_v17 = vmax.f32 %v1791_v13, 0.0 }
 0x21f   :  { %v1853_v19 = vmax.f32 %v1789_v15, 0.0 }
 0x220   :  { %v1895_v20 = vpack.c.bf16 %v1855_v17, %v1854_v16 }
 0x221   :  { %v1894_v21 = vpack.c.bf16 %v1853_v19, %v1852_v18  ;;  %v3630_v22 = vpop.f32.mrb[48].mxu1  ;;  %v242_v19 = vshrl.u32 %v239_v37, 7 }
 0x222   :  { %v1794_v23 = vadd.f32 %v3630_v22, %v4672_v31  ;;  %v1674_v24 = vpop.f32.mrb[49].mxu1 }
 0x223   :  { %v1792_v25 = vadd.f32 %v4672_v31, %v1674_v24  ;;  %v3631_v26 = vpop.f32.mrb[50].mxu1  ;;  %3692 = vmatprep.mubr.msk.bf16.mxu0 %vm171_vm4, %v1894_v21  ;;  %v238_v21 = vld [vmem:[%s5100_s26] sm:$0xf]  ;;  %v664_v22 = vsub.s32 0, %v242_v19  ;;  %v244_v37 = vadd.s32 16, %v242_v19 }
 0x224   :  { %v1795_v27 = vadd.f32 %v3631_v26, %v4672_v31  ;;  %v1677_v28 = vpop.f32.mrb[51].mxu1  ;;  %3693 = vmatmul.mubr.msk.bf16.gmra.mrb[48].mxu0 %vm171_vm4, %v1895_v20  ;;  %v1858_v30 = vmax.f32 %v1794_v23, 0.0  ;;  %v668_v20 = vsub.s32 1, %v242_v19  ;;  %v243_v23 = vadd.s32 8, %v242_v19 }
 0x225   :  { %v1793_v29 = vadd.f32 %v4672_v31, %v1677_v28  ;;  %v1856_v33 = vmax.f32 %v1792_v25, 0.0  ;;  %v665_v24 = vrot.slane %v238_v21, %v664_v22  ;;  %v3980_v25 = vmov 1.0|1.0  }
 0x226   :  { %v1859_v32 = vmax.f32 %v1795_v27, 0.0  ;;  %v245_v27 = vadd.s32 24, %v242_v19 }
 0x227   :  { %v1857_v34 = vmax.f32 %v1793_v29, 0.0  ;;  %vm678_vm14 = vcmp.eq.s32.totalorder %v242_v19, %v665_v24  ;;  %vm682_vm15 = vcmp.eq.s32.totalorder %v243_v23, %v665_v24  ;;  %vm686_vm6 = vcmp.eq.s32.totalorder %v244_v37, %v665_v24 }
 0x228   :  { %v1897_v35 = vpack.c.bf16 %v1859_v32, %v1858_v30  ;;  %vm4775_vm1 = vmpackc.low %vm682_vm15, %vm678_vm14  ;;  %vm690_vm7 = vcmp.eq.s32.totalorder %v245_v27, %v665_v24  ;;  %v4790_v32 = vld [vmem:[%s5088_s10] ss:$0 sm:$0xff] }
 0x229   :  { %v1896_v36 = vpack.c.bf16 %v1857_v34, %v1856_v33  ;;  %v3634_v38 = vpop.f32.mrb[52].mxu1  ;;  %vm4783_vm8 = vmpackc.low %vm690_vm7, %vm686_vm6 }
 0x22a   :  { %v1798_v39 = vadd.f32 %v3634_v38, %v4672_v31  ;;  %v1690_v40 = vpop.f32.mrb[53].mxu1 }
 0x22b   :  { %v1796_v42 = vadd.f32 %v4672_v31, %v1690_v40  ;;  %v3635_v43 = vpop.f32.mrb[54].mxu1  ;;  %3696 = vmatprep.mubr.msk.bf16.mxu0 %vm171_vm4, %v1896_v36 }
 0x22c   :  { %v1799_v45 = vadd.f32 %v3635_v43, %v4672_v31  ;;  %v1693_v46 = vpop.f32.mrb[55].mxu1  ;;  %3697 = vmatmul.mubr.msk.bf16.gmra.mrb[52].mxu0 %vm171_vm4, %v1897_v35  ;;  %v1862_v48 = vmax.f32 %v1798_v39, 0.0 }
 0x22d   :  { %v1797_v47 = vadd.f32 %v4672_v31, %v1693_v46  ;;  %v1860_v50 = vmax.f32 %v1796_v42, 0.0  ;;  %v676_v42 = vsub.s32 3, %v242_v19 }
 0x22e   :  { %v1863_v49 = vmax.f32 %v1799_v45, 0.0  ;;  %v672_v45 = vsub.s32 2, %v242_v19 }
 0x22f   :  { %v1861_v51 = vmax.f32 %v1797_v47, 0.0  ;;  %v677_v47 = vrot.slane %v238_v21, %v676_v42 }
 0x230   :  { %v1899_v52 = vpack.c.bf16 %v1863_v49, %v1862_v48  ;;  %v673_v48 = vrot.slane %v238_v21, %v672_v45 }
 0x231   :  { %v1898_v53 = vpack.c.bf16 %v1861_v51, %v1860_v50  ;;  %v3638_v54 = vpop.f32.mrb[56].mxu1  ;;  %vm681_vm9 = vcmp.eq.s32.totalorder %v242_v19, %v677_v47  ;;  %vm685_vm10 = vcmp.eq.s32.totalorder %v243_v23, %v677_v47 }
 0x232   :  { %v1802_v55 = vadd.f32 %v3638_v54, %v4672_v31  ;;  %v1706_v56 = vpop.f32.mrb[57].mxu1  ;;  %vm680_vm14 = vcmp.eq.s32.totalorder %v242_v19, %v673_v48  ;;  %vm684_vm15 = vcmp.eq.s32.totalorder %v243_v23, %v673_v48  ;;  %vm692_vm6 = vcmp.eq.s32.totalorder %v245_v27, %v673_v48 }
 0x233   :  { %v1800_v57 = vadd.f32 %v4672_v31, %v1706_v56  ;;  %v3639_v58 = vpop.f32.mrb[58].mxu1  ;;  %3700 = vmatprep.mubr.msk.bf16.mxu0 %vm171_vm4, %v1898_v53  ;;  %v3982_v53 = vmov 16  }
 0x234   :  { %v1803_v59 = vadd.f32 %v3639_v58, %v4672_v31  ;;  %v1709_v60 = vpop.f32.mrb[59].mxu1  ;;  %3701 = vmatmul.mubr.msk.bf16.gmra.mrb[56].mxu0 %vm171_vm4, %v1899_v52  ;;  %v1866_v62 = vmax.f32 %v1802_v55, 0.0  ;;  %3908 = vset.pattern.permute.xlu0 %v3982_v53 }
 0x235   :  { %v1801_v61 = vadd.f32 %v4672_v31, %v1709_v60  ;;  %v1864_v0 = vmax.f32 %v1800_v57, 0.0  ;;  %3909 = vset.pattern.permute.xlu1 %v3982_v53  ;;  %v2601_v57 = vld [vmem:[%s5090_s12] sm:$0xff]  ;;  %v2603_v60 = vld [vmem:[%s5090_s12 + $0x10] sm:$0xff] }
 0x236   :  { %v1867_v63 = vmax.f32 %v1803_v59, 0.0  ;;  %v2600_v53 = vld [vmem:[%s5089_s11] sm:$0xff] }
 0x237   :  { %v1865_v1 = vmax.f32 %v1801_v61, 0.0 }
 0x238   :  { %v1901_v2 = vpack.c.bf16 %v1867_v63, %v1866_v62 }
 0x239   :  { %v1900_v3 = vpack.c.bf16 %v1865_v1, %v1864_v0  ;;  %v3642_v4 = vpop.f32.mrb[60].mxu1 }
 0x23a   :  { %v1806_v6 = vadd.f32 %v3642_v4, %v4672_v31  ;;  %v1722_v7 = vpop.f32.mrb[61].mxu1 }
 0x23b   :  { %v1804_v8 = vadd.f32 %v4672_v31, %v1722_v7  ;;  %v3643_v9 = vpop.f32.mrb[62].mxu1  ;;  %3704 = vmatprep.mubr.msk.bf16.mxu0 %vm171_vm4, %v1900_v3 }
 0x23c   :  { %v1807_v10 = vadd.f32 %v3643_v9, %v4672_v31  ;;  %v1725_v11 = vpop.f32.mrb[63].mxu1  ;;  %3705 = vmatmul.mubr.msk.bf16.gmra.mrb[60].mxu0 %vm171_vm4, %v1901_v2  ;;  %v1870_v13 = vmax.f32 %v1806_v6, 0.0 }
 0x23d   :  { %v1805_v12 = vadd.f32 %v4672_v31, %v1725_v11  ;;  %v1868_v15 = vmax.f32 %v1804_v8, 0.0  ;;  %v669_v31 = vrot.slane %v238_v21, %v668_v20 }
 0x23e   :  { %v1871_v14 = vmax.f32 %v1807_v10, 0.0 }
 0x23f   :  { %v1869_v16 = vmax.f32 %v1805_v12, 0.0  ;;  %vm679_vm11 = vcmp.eq.s32.totalorder %v242_v19, %v669_v31  ;;  %vm683_vm12 = vcmp.eq.s32.totalorder %v243_v23, %v669_v31  ;;  %vm687_vm2 = vcmp.eq.s32.totalorder %v244_v37, %v669_v31 }
 0x240   :  { %v1903_v17 = vpack.c.bf16 %v1871_v14, %v1870_v13  ;;  %vm3264_vm13 = vmpackc.low %vm683_vm12, %vm679_vm11  ;;  %vm691_vm3 = vcmp.eq.s32.totalorder %v245_v27, %v669_v31  ;;  %vm689_vm11 = vcmp.eq.s32.totalorder %v244_v37, %v677_v47  ;;  %vm693_vm12 = vcmp.eq.s32.totalorder %v245_v27, %v677_v47 }
 0x241   :  { %v1902_v18 = vpack.c.bf16 %v1869_v16, %v1868_v15  ;;  %vm4779_vm5 = vmpackc.low %vm691_vm3, %vm687_vm2  ;;  %vm688_vm2 = vcmp.eq.s32.totalorder %v244_v37, %v673_v48 }
 0x242   :  { %vm4809_vm3 = vmpackc.low %vm684_vm15, %vm680_vm14 }
 0x243   :  { %3708 = vmatprep.mubr.msk.bf16.mxu0 %vm171_vm4, %v1902_v18  ;;  %vm4819_vm7 = vmpackc.low %vm693_vm12, %vm689_vm11  ;;  %vm2799_vm11 = vcmask 15360  }
 0x244   :  { %3709 = vmatmul.mubr.msk.bf16.gmra.mrb[64].mxu0 %vm171_vm4, %v1903_v17 }
 0x245   :  { %3265 = vmatprep.mubr.msk.bf16.mxu0 %vm3264_vm13, %v3980_v25  ;;  %vm4805_vm13 = vmpackc.low %vm685_vm10, %vm681_vm9 }
 0x246   :  { %vm4825_vm9 = vmpackc.low %vm692_vm6, %vm688_vm2 }
 0x29f   :  { %v3650_v30 = vpop.f32.mrb[4].mxu0 }
 0x2a0   :  { %v2057_v33 = vpop.f32.mrb[5].mxu0  ;;  %v4793_v35 = vadd.f32 %v3650_v30, %v4790_v32 }
 0x2a1   :  { %v3651_v34 = vpop.f32.mrb[6].mxu0  ;;  %v4799_v39 = vadd.f32 %v4790_v32, %v2057_v33 }
 0x2a2   :  { %v4796_v36 = vadd.f32 %v3651_v34, %v4790_v32  ;;  %v2060_v38 = vpop.f32.mrb[7].mxu0 }
 0x2a3   :  { %v2061_v40 = vadd.f32 %v4790_v32, %v2060_v38 }
 0x2a4   :  { %v2317_v43 = vpack.c.bf16 %v4796_v36, %v4793_v35 }
 0x2a5   :  { %v2316_v46 = vpack.c.bf16 %v2061_v40, %v4799_v39 }
 0x2a7   :  { %v3654_v49 = vpop.f32.mrb[8].mxu0 }
 0x2a8   :  { %v2073_v50 = vpop.f32.mrb[9].mxu0  ;;  %v4814_v54 = vadd.f32 %v3654_v49, %v4790_v32 }
 0x2a9   :  { %v3655_v52 = vpop.f32.mrb[10].mxu0  ;;  %v2074_v58 = vadd.f32 %v4790_v32, %v2073_v50 }
 0x2aa   :  { %v4817_v55 = vadd.f32 %v3655_v52, %v4790_v32  ;;  %v2076_v56 = vpop.f32.mrb[11].mxu0 }
 0x2ab   :  { %v2077_v59 = vadd.f32 %v4790_v32, %v2076_v56 }
 0x2ac   :  { %v2319_v61 = vpack.c.bf16 %v4817_v55, %v4814_v54 }
 0x2ad   :  { %v2318_v62 = vpack.c.bf16 %v2077_v59, %v2074_v58 }
 0x2af   :  { %v3658_v63 = vpop.f32.mrb[12].mxu0 }
 0x2b0   :  { %v2089_v0 = vpop.f32.mrb[13].mxu0  ;;  %v4832_v2 = vadd.f32 %v3658_v63, %v4790_v32 }
 0x2b1   :  { %v3659_v1 = vpop.f32.mrb[14].mxu0  ;;  %v2090_v6 = vadd.f32 %v4790_v32, %v2089_v0 }
 0x2b2   :  { %v4835_v3 = vadd.f32 %v3659_v1, %v4790_v32  ;;  %v2092_v4 = vpop.f32.mrb[15].mxu0 }
 0x2b3   :  { %v2093_v7 = vadd.f32 %v4790_v32, %v2092_v4 }
 0x2b4   :  { %v2321_v8 = vpack.c.bf16 %v4835_v3, %v4832_v2 }
 0x2b5   :  { %v2320_v9 = vpack.c.bf16 %v2093_v7, %v2090_v6 }
 0x2b7   :  { %v3662_v10 = vpop.f32.mrb[16].mxu0 }
 0x2b8   :  { %v2105_v11 = vpop.f32.mrb[17].mxu0  ;;  %v4842_v13 = vadd.f32 %v3662_v10, %v4790_v32 }
 0x2b9   :  { %v3663_v12 = vpop.f32.mrb[18].mxu0  ;;  %v2106_v16 = vadd.f32 %v4790_v32, %v2105_v11 }
 0x2ba   :  { %v4845_v14 = vadd.f32 %v3663_v12, %v4790_v32  ;;  %v2108_v15 = vpop.f32.mrb[19].mxu0 }
 0x2bb   :  { %v2109_v17 = vadd.f32 %v4790_v32, %v2108_v15 }
 0x2bc   :  { %v2323_v18 = vpack.c.bf16 %v4845_v14, %v4842_v13 }
 0x2bd   :  { %v2322_v19 = vpack.c.bf16 %v2109_v17, %v2106_v16 }
 0x2bf   :  { %v3666_v20 = vpop.f32.mrb[20].mxu0 }
 0x2c0   :  { %v2121_v21 = vpop.f32.mrb[21].mxu0  ;;  %v2130_v23 = vadd.f32 %v3666_v20, %v4790_v32 }
 0x2c1   :  { %v3667_v22 = vpop.f32.mrb[22].mxu0  ;;  %v2122_v37 = vadd.f32 %v4790_v32, %v2121_v21 }
 0x2c2   :  { %v2133_v31 = vadd.f32 %v3667_v22, %v4790_v32  ;;  %v2124_v24 = vpop.f32.mrb[23].mxu0 }
 0x2c3   :  { %v2125_v27 = vadd.f32 %v4790_v32, %v2124_v24 }
 0x2c4   :  { %v2325_v30 = vpack.c.bf16 %v2133_v31, %v2130_v23 }
 0x2c5   :  { %v2324_v33 = vpack.c.bf16 %v2125_v27, %v2122_v37 }
 0x2c7   :  { %v3670_v34 = vpop.f32.mrb[24].mxu0  ;;  %3406 = vmatprep.subr.bf16.mxu0 %v2324_v33 }
 0x2c8   :  { %v2137_v38 = vpop.f32.mrb[25].mxu0  ;;  %3407 = vmatpush3.bf16.msra.mxu0 %v2316_v46  ;;  %v2146_v40 = vadd.f32 %v3670_v34, %v4790_v32 }
 0x2c9   :  { %v3671_v39 = vpop.f32.mrb[26].mxu0  ;;  %3408 = vmatprep.subr.bf16.mxu0 %v2325_v30  ;;  %v2138_v47 = vadd.f32 %v4790_v32, %v2137_v38 }
 0x2ca   :  { %v2149_v42 = vadd.f32 %v3671_v39, %v4790_v32  ;;  %v2140_v45 = vpop.f32.mrb[27].mxu0 }
 0x2cb   :  { %v2141_v48 = vadd.f32 %v4790_v32, %v2140_v45 }
 0x2cc   :  { %v2327_v49 = vpack.c.bf16 %v2149_v42, %v2146_v40  ;;  %3409 = vmatpush3.bf16.msra.mxu0 %v2317_v43 }
 0x2cd   :  { %v2326_v50 = vpack.c.bf16 %v2141_v48, %v2138_v47 }
 0x2cf   :  { %v3674_v52 = vpop.f32.mrb[28].mxu0  ;;  %3410 = vmatprep.subr.bf16.mxu0 %v2326_v50 }
 0x2d0   :  { %v2153_v46 = vpop.f32.mrb[29].mxu0  ;;  %3411 = vmatpush3.bf16.msra.mxu0 %v2318_v62  ;;  %v2162_v55 = vadd.f32 %v3674_v52, %v4790_v32 }
 0x2d1   :  { %v3675_v54 = vpop.f32.mrb[30].mxu0  ;;  %3412 = vmatprep.subr.bf16.mxu0 %v2327_v49  ;;  %v2154_v59 = vadd.f32 %v4790_v32, %v2153_v46 }
 0x2d2   :  { %v2165_v56 = vadd.f32 %v3675_v54, %v4790_v32  ;;  %v2156_v58 = vpop.f32.mrb[31].mxu0 }
 0x2d3   :  { %v2157_v63 = vadd.f32 %v4790_v32, %v2156_v58 }
 0x2d4   :  { %v2329_v0 = vpack.c.bf16 %v2165_v56, %v2162_v55  ;;  %3413 = vmatpush3.bf16.msra.mxu0 %v2319_v61 }
 0x2d5   :  { %v2328_v35 = vpack.c.bf16 %v2157_v63, %v2154_v59 }
 0x2d7   :  { %v3678_v36 = vpop.f32.mrb[32].mxu0  ;;  %3414 = vmatprep.subr.bf16.mxu0 %v2328_v35 }
 0x2d8   :  { %v2169_v43 = vpop.f32.mrb[33].mxu0  ;;  %3415 = vmatpush3.bf16.msra.mxu0 %v2320_v9  ;;  %v2178_v62 = vadd.f32 %v3678_v36, %v4790_v32 }
 0x2d9   :  { %v3679_v1 = vpop.f32.mrb[34].mxu0  ;;  %3416 = vmatprep.subr.bf16.mxu0 %v2329_v0  ;;  %v2170_v4 = vadd.f32 %v4790_v32, %v2169_v43 }
 0x2da   :  { %v2181_v2 = vadd.f32 %v3679_v1, %v4790_v32  ;;  %v2172_v3 = vpop.f32.mrb[35].mxu0 }
 0x2db   :  { %v2173_v6 = vadd.f32 %v4790_v32, %v2172_v3 }
 0x2dc   :  { %v2331_v7 = vpack.c.bf16 %v2181_v2, %v2178_v62  ;;  %3417 = vmatpush3.bf16.msra.mxu0 %v2321_v8 }
 0x2dd   :  { %v2330_v10 = vpack.c.bf16 %v2173_v6, %v2170_v4 }
 0x2df   :  { %v3682_v61 = vpop.f32.mrb[36].mxu0  ;;  %3418 = vmatprep.subr.bf16.mxu0 %v2330_v10 }
 0x2e0   :  { %v2185_v11 = vpop.f32.mrb[37].mxu0  ;;  %3419 = vmatpush3.bf16.msra.mxu0 %v2322_v19  ;;  %v4871_v9 = vadd.f32 %v3682_v61, %v4790_v32 }
 0x2e1   :  { %v3683_v12 = vpop.f32.mrb[38].mxu0  ;;  %3420 = vmatprep.subr.bf16.mxu0 %v2331_v7  ;;  %v2186_v17 = vadd.f32 %v4790_v32, %v2185_v11 }
 0x2e2   :  { %v4874_v15 = vadd.f32 %v3683_v12, %v4790_v32  ;;  %v2188_v16 = vpop.f32.mrb[39].mxu0 }
 0x2e3   :  { %v2189_v20 = vadd.f32 %v4790_v32, %v2188_v16 }
 0x2e4   :  { %v2333_v8 = vpack.c.bf16 %v4874_v15, %v4871_v9  ;;  %3421 = vmatpush3.bf16.msra.mxu0 %v2323_v18 }
 0x2e5   :  { %v2332_v19 = vpack.c.bf16 %v2189_v20, %v2186_v17 }
 0x2e7   :  { %v3686_v21 = vpop.f32.mrb[40].mxu0  ;;  %3267 = vmatmul.mubr.msk.bf16.vlgmr.msra.gmra.mrb[68].mxu0 %vm4775_vm1, %v3980_v25  ;;  %vm3981_vm1 = vmmov 0  }
 0x2e8   :  { %v2201_v22 = vpop.f32.mrb[41].mxu0  ;;  %3269 = vmatprep.mubr.msk.bf16.mxu0 %vm4779_vm5, %v3980_v25  ;;  %v4890_v31 = vadd.f32 %v3686_v21, %v4790_v32  ;;  %vm2812_vm5 = vcmask 1041408  }
 0x2e9   :  { %v3687_v23 = vpop.f32.mrb[42].mxu0  ;;  %v2202_v14 = vadd.f32 %v4790_v32, %v2201_v22 }
 0x2ea   :  { %v4893_v24 = vadd.f32 %v3687_v23, %v4790_v32  ;;  %v2204_v13 = vpop.f32.mrb[43].mxu0 }
 0x2eb   :  { %v2205_v18 = vadd.f32 %v4790_v32, %v2204_v13 }
 0x2ec   :  { %v2335_v26 = vpack.c.bf16 %v4893_v24, %v4890_v31 }
 0x2ed   :  { %v2334_v37 = vpack.c.bf16 %v2205_v18, %v2202_v14 }
 0x2ef   :  { %v3690_v27 = vpop.f32.mrb[44].mxu0  ;;  %3271 = vmatmul.mubr.msk.bf16.gmra.mrb[72].mxu0 %vm4783_vm8, %v3980_v25 }
 0x2f0   :  { %v2217_v28 = vpop.f32.mrb[45].mxu0  ;;  %3273 = vmatprep.mubr.msk.bf16.mxu0 %vm4805_vm13, %v3980_v25  ;;  %v4906_v33 = vadd.f32 %v3690_v27, %v4790_v32 }
 0x2f1   :  { %v3691_v30 = vpop.f32.mrb[46].mxu0  ;;  %v2218_v39 = vadd.f32 %v4790_v32, %v2217_v28 }
 0x2f2   :  { %v4909_v34 = vadd.f32 %v3691_v30, %v4790_v32  ;;  %v2220_v38 = vpop.f32.mrb[47].mxu0 }
 0x2f3   :  { %v2221_v40 = vadd.f32 %v4790_v32, %v2220_v38 }
 0x2f4   :  { %v2337_v29 = vpack.c.bf16 %v4909_v34, %v4906_v33 }
 0x2f5   :  { %v2336_v42 = vpack.c.bf16 %v2221_v40, %v2218_v39  ;;  %v2604_v39 = vld [vmem:[%s5090_s12 + $0x18] sm:$0xff] }
 0x2f6   :  { %v3789_v40 = vpack.c.bf16 %v2604_v39, %v2603_v60 }
 0x2f7   :  { %v3694_v45 = vpop.f32.mrb[48].mxu0 }
 0x2f8   :  { %v2233_v47 = vpop.f32.mrb[49].mxu0  ;;  %v2242_v48 = vadd.f32 %v3694_v45, %v4790_v32 }
 0x2f9   :  { %v3695_v51 = vpop.f32.mrb[50].mxu0  ;;  %v2234_v52 = vadd.f32 %v4790_v32, %v2233_v47  ;;  %v2607_v47 = vld [vmem:[%s5090_s12 + $0x30] sm:$0xff] }
 0x2fa   :  { %v2245_v49 = vadd.f32 %v3695_v51, %v4790_v32  ;;  %v2236_v50 = vpop.f32.mrb[51].mxu0  ;;  %v2608_v51 = vld [vmem:[%s5090_s12 + $0x38] sm:$0xff] }
 0x2fb   :  { %v2237_v46 = vadd.f32 %v4790_v32, %v2236_v50  ;;  %v2610_v50 = vld [vmem:[%s5090_s12 + $0x48] sm:$0xff] }
 0x2fc   :  { %v2339_v54 = vpack.c.bf16 %v2245_v49, %v2242_v48  ;;  %v3797_v48 = vpack.c.bf16 %v2608_v51, %v2607_v47  ;;  %v2609_v49 = vld [vmem:[%s5090_s12 + $0x40] sm:$0xff] }
 0x2fd   :  { %v2338_v55 = vpack.c.bf16 %v2237_v46, %v2234_v52  ;;  %v3801_v52 = vpack.c.bf16 %v2610_v50, %v2609_v49 }
 0x2ff   :  { %v3698_v56 = vpop.f32.mrb[52].mxu0 }
 0x300   :  { %v2249_v58 = vpop.f32.mrb[53].mxu0  ;;  %v2258_v63 = vadd.f32 %v3698_v56, %v4790_v32 }
 0x301   :  { %v3699_v59 = vpop.f32.mrb[54].mxu0  ;;  %v2250_v36 = vadd.f32 %v4790_v32, %v2249_v58 }
 0x302   :  { %v2261_v0 = vadd.f32 %v3699_v59, %v4790_v32  ;;  %v2252_v35 = vpop.f32.mrb[55].mxu0 }
 0x303   :  { %v2253_v43 = vadd.f32 %v4790_v32, %v2252_v35 }
 0x304   :  { %v2341_v1 = vpack.c.bf16 %v2261_v0, %v2258_v63 }
 0x305   :  { %v2340_v62 = vpack.c.bf16 %v2253_v43, %v2250_v36 }
 0x307   :  { %v3702_v2 = vpop.f32.mrb[56].mxu0  ;;  %3434 = vmatprep.subr.bf16.mxu0 %v2340_v62 }
 0x308   :  { %v2265_v3 = vpop.f32.mrb[57].mxu0  ;;  %3435 = vmatpush3.bf16.msra.mxu0 %v2332_v19  ;;  %v2274_v6 = vadd.f32 %v3702_v2, %v4790_v32 }
 0x309   :  { %v3703_v4 = vpop.f32.mrb[58].mxu0  ;;  %3436 = vmatprep.subr.bf16.mxu0 %v2341_v1  ;;  %v2266_v61 = vadd.f32 %v4790_v32, %v2265_v3 }
 0x30a   :  { %v2277_v7 = vadd.f32 %v3703_v4, %v4790_v32  ;;  %v2268_v10 = vpop.f32.mrb[59].mxu0 }
 0x30b   :  { %v2269_v11 = vadd.f32 %v4790_v32, %v2268_v10 }
 0x30c   :  { %v2343_v12 = vpack.c.bf16 %v2277_v7, %v2274_v6  ;;  %3437 = vmatpush3.bf16.msra.mxu0 %v2333_v8 }
 0x30d   :  { %v2342_v9 = vpack.c.bf16 %v2269_v11, %v2266_v61 }
 0x30f   :  { %v3706_v15 = vpop.f32.mrb[60].mxu0  ;;  %3438 = vmatprep.subr.bf16.mxu0 %v2342_v9 }
 0x310   :  { %v2281_v16 = vpop.f32.mrb[61].mxu0  ;;  %3439 = vmatpush3.bf16.msra.mxu0 %v2334_v37  ;;  %v2290_v20 = vadd.f32 %v3706_v15, %v4790_v32 }
 0x311   :  { %v3707_v17 = vpop.f32.mrb[62].mxu0  ;;  %3440 = vmatprep.subr.bf16.mxu0 %v2343_v12  ;;  %v2282_v22 = vadd.f32 %v4790_v32, %v2281_v16 }
 0x312   :  { %v2293_v19 = vadd.f32 %v3707_v17, %v4790_v32  ;;  %v2284_v21 = vpop.f32.mrb[63].mxu0 }
 0x313   :  { %v2285_v23 = vadd.f32 %v4790_v32, %v2284_v21  ;;  %v2613_v21 = vld [vmem:[%s5090_s12 + $0x60] sm:$0xff] }
 0x314   :  { %v2345_v31 = vpack.c.bf16 %v2293_v19, %v2290_v20  ;;  %3441 = vmatpush3.bf16.msra.mxu0 %v2335_v26  ;;  %v2494_v26 = vld [vmem:[%s5091_s13] sm:$0xff]  ;;  %v2611_v20 = vld [vmem:[%s5090_s12 + $0x50] sm:$0xff]  ;;  %v2612_v19 = vld [vmem:[%s5090_s12 + $0x58] sm:$0xff] }
 0x315   :  { %v2344_v24 = vpack.c.bf16 %v2285_v23, %v2282_v22  ;;  %v3805_v23 = vpack.c.bf16 %v2612_v19, %v2611_v20  ;;  %v3295_v19 = vld [vmem:[%s5094_s16] ss:$0 sm:$0xff] }
 0x317   :  { %v3710_v8 = vpop.f32.mrb[64].mxu0  ;;  %3442 = vmatprep.subr.bf16.mxu0 %v2344_v24 }
 0x318   :  { %v2297_v13 = vpop.f32.mrb[65].mxu0  ;;  %3443 = vmatpush3.bf16.msra.mxu0 %v2336_v42  ;;  %v2306_v18 = vadd.f32 %v3710_v8, %v4790_v32  ;;  %v2606_v42 = vld [vmem:[%s5090_s12 + $0x28] sm:$0xff] }
 0x319   :  { %v3711_v14 = vpop.f32.mrb[66].mxu0  ;;  %3444 = vmatprep.subr.bf16.mxu0 %v2345_v31  ;;  %v2298_v28 = vadd.f32 %v4790_v32, %v2297_v13  ;;  %v2614_v31 = vld [vmem:[%s5090_s12 + $0x68] sm:$0xff] }
 0x31a   :  { %v2309_v37 = vadd.f32 %v3711_v14, %v4790_v32  ;;  %v2300_v27 = vpop.f32.mrb[67].mxu0  ;;  %v3809_v13 = vpack.c.bf16 %v2614_v31, %v2613_v21 }
 0x31b   :  { %v2301_v30 = vadd.f32 %v4790_v32, %v2300_v27  ;;  %v2493_v32 = vld [vmem:[%s5083_s5] sm:$0x3] }
 0x31c   :  { %v2347_v33 = vpack.c.bf16 %v2309_v37, %v2306_v18  ;;  %3445 = vmatpush3.bf16.msra.mxu0 %v2337_v29  ;;  %v2605_v29 = vld [vmem:[%s5090_s12 + $0x20] sm:$0xff] }
 0x31d   :  { %v2346_v34 = vpack.c.bf16 %v2301_v30, %v2298_v28  ;;  %v3793_v45 = vpack.c.bf16 %v2606_v42, %v2605_v29  ;;  %v2568_v27 = vld [vmem:[%s5082_s4] sm:$0xff]  ;;  %v2615_v28 = vld [vmem:[%s5090_s12 + $0x70] sm:$0xff]  ;;  %v2616_v30 = vld [vmem:[%s5090_s12 + $0x78] sm:$0xff] }
 0x31f   :  { %3446 = vmatprep.subr.bf16.mxu0 %v2346_v34  ;;  %v2569_v34 = vld [vmem:[%s5082_s4 + $0x8] sm:$0xff] }
 0x320   :  { %3447 = vmatpush3.bf16.msra.mxu0 %v2338_v55 }
 0x321   :  { %3448 = vmatprep.subr.bf16.mxu0 %v2347_v33  ;;  %v3813_v33 = vpack.c.bf16 %v2616_v30, %v2615_v28 }
 0x324   :  { %3449 = vmatpush3.bf16.msra.mxu0 %v2339_v54 }
 0x325   :  { %3712 = vmatprep.subr.mxu0 %v3979_v44 }
 0x327   :  { %3275 = vmatmul.mubr.msk.bf16.vlgmr.msra.gmra.mrb[76].mxu0 %vm4809_vm3, %v3980_v25 }
 0x328   :  { %3277 = vmatprep.mubr.msk.bf16.mxu0 %vm4819_vm7, %v3980_v25  ;;  %3713 = vmatpush3.msra.mxu0 %v2494_v26  ;;  %v2570_v26 = vld [vmem:[%s5082_s4 + $0x10] sm:$0xff] }
 0x32f   :  { %3279 = vmatmul.mubr.msk.bf16.gmra.mrb[80].mxu0 %vm4825_vm9, %v3980_v25  ;;  %v2602_v25 = vld [vmem:[%s5090_s12 + $0x8] sm:$0xff] }
 0x330   :  { %3714 = vmatprep.mubr.msk.f32.mxu0 %vm3981_vm1, %v3979_v44  ;;  %v3785_v38 = vpack.c.bf16 %v2602_v25, %v2601_v57 }
 0x332   :  { %3786 = vmatprep.subr.bf16.mxu0 %v3785_v38 }
 0x337   :  { %3715 = vmatmul.mubr.msk.f32.vlgmr.msra.gmra.mrb[84].mxu0 %vm71_vm0, %v2493_v32  ;;  %v2571_v32 = vld [vmem:[%s5082_s4 + $0x18] sm:$0xff] }
 0x338   :  { %3788 = vmatpush3.bf16.msra.mxu0 %v3785_v38 }
 0x339   :  { %3790 = vmatprep.subr.bf16.mxu0 %v3789_v40 }
 0x33c   :  { %3792 = vmatpush3.bf16.msra.mxu0 %v3789_v40 }
 0x33d   :  { %3794 = vmatprep.subr.bf16.mxu0 %v3793_v45 }
 0x340   :  { %3796 = vmatpush3.bf16.msra.mxu0 %v3793_v45 }
 0x341   :  { %3798 = vmatprep.subr.bf16.mxu0 %v3797_v48 }
 0x344   :  { %3800 = vmatpush3.bf16.msra.mxu0 %v3797_v48 }
 0x345   :  { %3802 = vmatprep.subr.bf16.mxu0 %v3801_v52 }
 0x348   :  { %3804 = vmatpush3.bf16.msra.mxu0 %v3801_v52  ;;  %v2596_v52 = vld [vmem:[%s5081_s3] sm:$0xff] }
 0x349   :  { %3806 = vmatprep.subr.bf16.mxu0 %v3805_v23 }
 0x34c   :  { %3808 = vmatpush3.bf16.msra.mxu0 %v3805_v23 }
 0x34d   :  { %3810 = vmatprep.subr.bf16.mxu0 %v3809_v13 }
 0x350   :  { %3812 = vmatpush3.bf16.msra.mxu0 %v3809_v13 }
 0x351   :  { %3814 = vmatprep.subr.bf16.mxu0 %v3813_v33 }
 0x354   :  { %3816 = vmatpush3.bf16.msra.mxu0 %v3813_v33 }
 0x355   :  { %3755 = vmatprep.subr.mxu0 %v2600_v53 }
 0x3ba   :  { %v3422_v46 = vpop.f32.mrb[68].mxu0 }
 0x3bb   :  { %v3423_v54 = vpop.f32.mrb[69].mxu0 }
 0x3bc   :  { %v3424_v55 = vadd.f32 %v3423_v54, %v3422_v46  ;;  %v3425_v56 = vpop.f32.mrb[70].mxu0  ;;  %v2920_v46 = vld [vmem:[%s5093_s15] sm:$0xff]  ;;  %v2921_v54 = vld [vmem:[%s5093_s15 + $0x8] sm:$0xff] }
 0x3bd   :  { %v3426_v58 = vpop.f32.mrb[71].mxu0 }
 0x3be   :  { %v3427_v59 = vadd.f32 %v3426_v58, %v3425_v56  ;;  %v2598_v56 = vld [vmem:[%s5081_s3 + $0x10] sm:$0xff]  ;;  %v3817_v58 = vpack.c.bf16 %v2921_v54, %v2920_v46 }
 0x3c2   :  { %v3428_v63 = vpop.f32.mrb[72].mxu0 }
 0x3c3   :  { %v3429_v0 = vpop.f32.mrb[73].mxu0 }
 0x3c4   :  { %v3430_v35 = vadd.f32 %v3429_v0, %v3428_v63  ;;  %v3431_v36 = vpop.f32.mrb[74].mxu0  ;;  %v2599_v0 = vld [vmem:[%s5081_s3 + $0x18] sm:$0xff] }
 0x3c5   :  { %v3432_v43 = vpop.f32.mrb[75].mxu0 }
 0x3c6   :  { %v3433_v1 = vadd.f32 %v3432_v43, %v3431_v36 }
 0x3fa   :  { %v3450_v62 = vpop.f32.mrb[76].mxu0 }
 0x3fb   :  { %v3451_v2 = vpop.f32.mrb[77].mxu0 }
 0x3fc   :  { %v3452_v3 = vadd.f32 %v3451_v2, %v3450_v62  ;;  %v3453_v4 = vpop.f32.mrb[78].mxu0  ;;  %v2922_v2 = vld [vmem:[%s5093_s15 + $0x10] sm:$0xff] }
 0x3fd   :  { %v3454_v6 = vpop.f32.mrb[79].mxu0 }
 0x3fe   :  { %v2432_v7 = vadd.f32 %v3452_v3, %v3424_v55  ;;  %v3455_v10 = vadd.f32 %v3454_v6, %v3453_v4  ;;  %v2597_v55 = vld [vmem:[%s5081_s3 + $0x8] sm:$0xff]  ;;  %v2923_v3 = vld [vmem:[%s5093_s15 + $0x18] sm:$0xff] }
 0x3ff   :  { %v3821_v4 = vpack.c.bf16 %v2923_v3, %v2922_v2 }
 0x400   :  { %v2435_v61 = vadd.f32 %v3455_v10, %v3427_v59  ;;  %v2461_v11 = vmax.f32 %v2432_v7, 1.0 }
 0x402   :  { %v3456_v12 = vpop.f32.mrb[80].mxu0  ;;  %2467 = vperm.xlu0 %3908, %v2461_v11   ;;  %v2462_v9 = vmax.f32 %v2435_v61, 1.0 }
 0x403   :  { %v3457_v15 = vpop.f32.mrb[81].mxu0 }
 0x404   :  { %v3458_v16 = vadd.f32 %v3457_v15, %v3456_v12  ;;  %v3459_v17 = vpop.f32.mrb[82].mxu0  ;;  %2472 = vperm.xlu1 %3909, %v2462_v9  }
 0x405   :  { %v3460_v22 = vpop.f32.mrb[83].mxu0 }
 0x406   :  { %v2440_v24 = vadd.f32 %v3458_v16, %v3430_v35  ;;  %v3461_v8 = vadd.f32 %v3460_v22, %v3459_v17 }
 0x408   :  { %v2443_v14 = vadd.f32 %v3461_v8, %v3433_v1  ;;  %v2463_v18 = vmax.f32 %v2440_v24, 1.0 }
 0x40a   :  { %2477 = vperm.xlu1 %3909, %v2463_v18   ;;  %v2464_v37 = vmax.f32 %v2443_v14, 1.0  ;;  %v2564_v57 = vpop.f32.mrb[84].mxu0 }
 0x40b   :  { %v3716_v25 = vpop.f32.mrb[85].mxu0 }
 0x40c   :  { %2482 = vperm.xlu0 %3908, %v2464_v37  }
 0x40e   :  { %3910 = vset.pattern.permute.xlu1 %v3978_v5 }
 0x40f   :  { %2573 = vperm.xlu1 %3910, %v2568_v27  }
 0x410   :  { %3911 = vset.pattern.permute.xlu0 %v3978_v5 }
 0x411   :  { %2576 = vperm.xlu0 %3911, %v2569_v34  }
 0x413   :  { %2579 = vperm.xlu1 %3910, %v2570_v26  }
 0x417   :  { %2582 = vperm.xlu1 %3910, %v2571_v32  }
 0x481   :  { %v2468_v5 = vpop.permute.xlu0 %2467 }
 0x482   :  { %3946 = vrcp.f32 %v2468_v5 }
 0x483   :  { %v2473_v60 = vpop.permute.xlu1 %2472 }
 0x484   :  { %3948 = vrcp.f32 %v2473_v60 }
 0x489   :  { %v2478_v38 = vpop.permute.xlu1 %2477 }
 0x48a   :  { %3950 = vrcp.f32 %v2478_v38 }
 0x48b   :  { %v2483_v39 = vpop.permute.xlu0 %2482 }
 0x48c   :  { %v3947_v40 = vpop.eup %3946  ;;  %3952 = vrcp.f32 %v2483_v39 }
 0x48d   :  { %v2486_v29 = vmul.f32 %v3947_v40, %v2432_v7 }
 0x48e   :  { %v3949_v42 = vpop.eup %3948  ;;  %v2574_v49 = vpop.permute.xlu1 %2573 }
 0x48f   :  { %3749 = vmatprep.mubr.f32.mxu0 %v2486_v29  ;;  %v2488_v45 = vmul.f32 %v3949_v42, %v2435_v61  ;;  %vm2584_vm8 = vcmp.eq.s32.totalorder %v4415_v41, %v2574_v49 }
 0x490   :  { %v2577_v63 = vpop.permute.xlu0 %2576  ;;  %v3281_v35 = vsel %vm2584_vm8, 1.0, %v3979_v44 }
 0x491   :  { %3750 = vmatmul.mubr.f32.vlgmr.msra.gmra.mrb[86].mxu0 %v2488_v45  ;;  %vm2585_vm10 = vcmp.eq.s32.totalorder %v4415_v41, %v2577_v63 }
 0x492   :  { %3756 = vmatpush3.msra.mxu0 %v2600_v53  ;;  %v2580_v59 = vpop.permute.xlu1 %2579  ;;  %v3282_v36 = vsel %vm2585_vm10, 1.0, %v3979_v44 }
 0x493   :  { %3763 = vmatprep.subr.msk.mxu0 %vm2812_vm5, %v2564_v57  ;;  %vm2586_vm12 = vcmp.eq.s32.totalorder %v4415_v41, %v2580_v59 }
 0x494   :  { %v3951_v47 = vpop.eup %3950  ;;  %v3283_v1 = vsel %vm2586_vm12, 1.0, %v3979_v44 }
 0x495   :  { %v2490_v51 = vmul.f32 %v3951_v47, %v2440_v24 }
 0x496   :  { %v3953_v48 = vpop.eup %3952  ;;  %v2583_v43 = vpop.permute.xlu1 %2582 }
 0x497   :  { %3752 = vmatprep.mubr.f32.mxu0 %v2490_v51  ;;  %v2492_v50 = vmul.f32 %v3953_v48, %v2443_v14  ;;  %vm2587_vm13 = vcmp.eq.s32.totalorder %v4415_v41, %v2583_v43  ;;  %v3294_v41 = vld [vmem:[%s5092_s14] ss:$0 sm:$0xff] }
 0x498   :  { %v3284_v62 = vsel %vm2587_vm13, 1.0, %v3979_v44 }
 0x499   :  { %3753 = vmatmul.mubr.f32.gmra.mrb[88].mxu0 %v2492_v50 }
 0x49a   :  { %3757 = vmatprep.mubr.msk.f32.mxu0 %vm71_vm0, %v2596_v52 }
 0x49d   :  { %3758 = vmatmul.mubr.msk.f32.vlgmr.msra.gmra.mrb[86].mxu0 %vm71_vm0, %v2597_v55 }
 0x49e   :  { %3760 = vmatprep.mubr.msk.f32.mxu0 %vm71_vm0, %v2598_v56  ;;  %3764 = vmatpush3.msk.msra.mxu0 %vm2812_vm5, %v2564_v57 }
 0x49f   :  { %3818 = vmatprep.subr.bf16.mxu0 %v3817_v58 }
 0x4a1   :  { %3761 = vmatmul.mubr.msk.f32.gmra.mrb[88].mxu0 %vm71_vm0, %v2599_v0 }
 0x4a2   :  { %3765 = vmatprep.mubr.msk.f32.mxu0 %vm2799_vm11, %v3281_v35 }
 0x4a5   :  { %3766 = vmatmul.mubr.msk.f32.vlgmr.msra.gmra.mrb[86].mxu0 %vm2799_vm11, %v3282_v36 }
 0x4a6   :  { %3768 = vmatprep.mubr.msk.f32.mxu0 %vm2799_vm11, %v3283_v1  ;;  %3820 = vmatpush3.bf16.msra.mxu0 %v3817_v58 }
 0x4a7   :  { %3822 = vmatprep.subr.bf16.mxu0 %v3821_v4 }
 0x4a9   :  { %3769 = vmatmul.mubr.msk.f32.gmra.mrb[88].mxu0 %vm2799_vm11, %v3284_v62 }
 0x4aa   :  { %3824 = vmatpush3.bf16.msra.mxu0 %v3821_v4 }
 0x578   :  { %v3767_v6 = vpop.f32.mrb[86].mxu0 }
 0x579   :  { %v2913_v7 = vadd.f32 %v3767_v6, %v3294_v41  ;;  %v2882_v10 = vpop.f32.mrb[87].mxu0 }
 0x57a   :  { %v2912_v44 = vadd.f32 %v3294_v41, %v2882_v10 }
 0x57b   :  { %v2917_v12 = vmax.f32 %v2913_v7, 0.0 }
 0x57c   :  { %v2916_v61 = vmax.f32 %v2912_v44, 0.0  ;;  %v3770_v11 = vpop.f32.mrb[88].mxu0 }
 0x57d   :  { %v2915_v9 = vadd.f32 %v3770_v11, %v3294_v41  ;;  %v2892_v15 = vpop.f32.mrb[89].mxu0 }
 0x57e   :  { %v2914_v16 = vadd.f32 %v3294_v41, %v2892_v15  ;;  %3779 = vmatprep.mubr.msk.f32.mxu0 %vm171_vm4, %v2916_v61 }
 0x57f   :  { %3780 = vmatmul.mubr.msk.f32.vlgmr.msra.gmra.mrb[90].mxu0 %vm171_vm4, %v2917_v12  ;;  %v2919_v20 = vmax.f32 %v2915_v9, 0.0 }
 0x580   :  { %v2918_v17 = vmax.f32 %v2914_v16, 0.0 }
 0x582   :  { %3782 = vmatprep.mubr.msk.f32.mxu0 %vm171_vm4, %v2918_v17 }
 0x583   :  { %3783 = vmatmul.mubr.msk.f32.gmra.mrb[92].mxu0 %vm171_vm4, %v2919_v20 }
 0x652   :  { %v3781_v21 = vpop.f32.mrb[90].mxu0 }
 0x653   :  { %v3015_v22 = vadd.f32 %v3781_v21, %v3295_v19  ;;  %v3009_v23 = vpop.f32.mrb[91].mxu0 }
 0x654   :  { %v3010_v31 = vadd.f32 %v3295_v19, %v3009_v23 }
 0x655   :  { %3029 = vst [vmem:[#allocation4 + $0x8] sm:$0xff] %v3015_v22 }
 0x656   :  { %3028 = vst [vmem:[#allocation4] sm:$0xff] %v3010_v31  ;;  %v3784_v24 = vpop.f32.mrb[92].mxu0 }
 0x657   :  { %v3025_v8 = vadd.f32 %v3784_v24, %v3295_v19  ;;  %v3019_v13 = vpop.f32.mrb[93].mxu0 }
 0x658   :  { %v3020_v14 = vadd.f32 %v3295_v19, %v3019_v13 }
 0x659   :  { %3031 = vst [vmem:[#allocation4 + $0x18] sm:$0xff] %v3025_v8 }
 0x65a   :  { %3030 = vst [vmem:[#allocation4 + $0x10] sm:$0xff] %v3020_v14 }
 0x65b   :  { %3965 = shalt.err (!%p3962_p4)
}
 0x65c   :  { %s3966_s8 = scalar_lea.hbm %s5095_s17, 512 }
 0x65d   :  { %p3967_p5 = scmp.ne.s32.totalorder %s5095_s17, %s3966_s8  ;;  %p3970_p6 = scmp.lt.u32.totalorder %s3966_s8, %s5095_s17 }
 0x65f   :  { %p3972_p7 = pnand %p3970_p6, %p3967_p5 }
 0x661   :  { %3975 = shalt.err (!%p3972_p7)
}
 0x662   :  { %s3984_s4 = smov 128   ;;  %s3985_s11 = smov 8  }
 0x663   :  { %3043 = dma.vmem_to_hbm [thread:$0]  %s3038_s23, 512, %s5095_s17, [#allocation5], %s3984_s4, %s3984_s4, %s3985_s11  }
 0x664   :  { %3976 = dma.done.wait [#allocation5], 512  }
 0x665   :  { %3977 = vsyncadd [#allocation5], 4294966784 }
 0x666   :  { %3047 = vsyncpa [#allocation5], 1 }

</bundles_post_ra>
